<compile_context>
chip_gen: v6e
topology: v6e:2x2x1
jax: 0.10.0
libtpu: 0.0.40
codegen_flags: <defaults>
</compile_context>

<pallas_src>
import jax
import jax.numpy as jnp
from jax.experimental import pallas as pl
from jax.experimental.pallas import tpu as pltpu

_LANE = 128            # TPU vreg lane width
_MAX_TILE_ROWS = 2048  # 3 arrays x 2 bufs x 2048*128*4B = 6 MiB VMEM (fits v5e/v6e/v7x)
_SMALL_N = 1024        # below this a fused XLA abs beats any standalone pallas_call


def _mae_kernel(inp_ref, tgt_ref, out_ref):
    # Pure VPU elementwise |a - b|; vsub+vabs co-issue in VALU slots that are
    # idle anyway — the kernel is HBM-bound on all generations.
    out_ref[...] = jnp.abs(inp_ref[...] - tgt_ref[...]).astype(out_ref.dtype)


def _sublane_multiple(dtype):
    # f32 -> 8, bf16/f16 -> 16, int8/fp8 -> 32 (packed sublane layouts).
    return {4: 8, 2: 16, 1: 32}.get(jnp.dtype(dtype).itemsize, 8)


def mean_absolute_error_metric(inputs, targets):
    """Pallas equivalent of MeanAbsoluteErrorMetric.forward.

    inputs, targets: (batch, window, 1) float32 (any matching shape accepted)
    returns: (batch*window,) float32 elementwise absolute errors.
    """
    assert inputs.shape == targets.shape, "inputs/targets shape mismatch"
    n = inputs.size

    inp_flat = jnp.reshape(inputs, (n,))
    tgt_flat = jnp.reshape(targets, (n,))

    if n == 0:
        return jnp.zeros((0,), jnp.float32)

    if n <= _SMALL_N:
        # Fast path for the real CRTP_LSTM case (N = 16): fused XLA abs is
        # essentially free next to a standalone pallas_call.
        return jnp.abs(inp_flat.astype(jnp.float32) - tgt_flat.astype(jnp.float32))

    # Lane-dense layout: pad only up to the next multiple of 128 lanes.
    rows = -(-n // _LANE)              # ceil(N / 128)
    n_padded = rows * _LANE
    pad = n_padded - n
    if pad:
        inp_flat = jnp.pad(inp_flat, (0, pad))
        tgt_flat = jnp.pad(tgt_flat, (0, pad))

    inp2 = inp_flat.reshape(rows, _LANE)
    tgt2 = tgt_flat.reshape(rows, _LANE)

    sub = _sublane_multiple(inputs.dtype)
    tm = min(_MAX_TILE_ROWS, -(-rows // sub) * sub)  # round up to sublane mult, cap
    grid = (pl.cdiv(rows, tm),)        # ragged last block handled by Pallas

    out2 = pl.pallas_call(
        _mae_kernel,
        out_shape=jax.ShapeDtypeStruct((rows, _LANE), jnp.float32),
        grid=grid,
        in_specs=[
            pl.BlockSpec((tm, _LANE), lambda i: (i, 0)),
            pl.BlockSpec((tm, _LANE), lambda i: (i, 0)),
        ],
        out_specs=pl.BlockSpec((tm, _LANE), lambda i: (i, 0)),
        compiler_params=pltpu.CompilerParams(
            # NOTE: on v7x, pltpu.CORE_PARALLEL would shard the grid across
            # the 2 TensorCores; plain "parallel" is kept for portability.
            dimension_semantics=("parallel",),
            vmem_limit_bytes=32 * 1024 * 1024,  # actual use ~6 MiB at TM=2048
        ),
        cost_estimate=pl.CostEstimate(
            flops=2 * n, transcendentals=0, bytes_accessed=12 * n),
    )(inp2, tgt2)

    out_flat = out2.reshape(n_padded)
    # Slice only when lane padding was actually added (<=127 junk elements).
    return out_flat[:n] if pad else out_flat


if __name__ == "__main__":
    key = jax.random.PRNGKey(0)

    def _run_and_check(batch, window, k):
        k1, k2 = jax.random.split(k)
        inputs = jax.random.uniform(k1, (batch, window, 1), dtype=jnp.float32) * 10.0
        targets = jax.random.uniform(k2, (batch, window, 1), dtype=jnp.float32) * 10.0
        out = jax.block_until_ready(mean_absolute_error_metric(inputs, targets))
        ref = jnp.abs(jnp.reshape(inputs, (-1,)) - jnp.reshape(targets, (-1,)))
        assert out.shape == (batch * window,), f"bad shape {out.shape}"
        assert jnp.allclose(out, ref, atol=1e-6), "mismatch vs reference"

    k0, k1, k2 = jax.random.split(key, 3)

    # 1) Real CRTP_LSTM size (batch=2, window=8) -> tiny-N fused fast path.
    _run_and_check(2, 8, k0)

    # 2) Larger size exercising the Pallas path with a multi-step grid and a
    #    ragged (partial) last row-block, no lane padding (N = 262400 = 2050*128).
    _run_and_check(16, 16400, k1)

    # 3) Ragged size exercising the <=127-lane padding + output slice path.
    _run_and_check(3, 1000, k2)

    print("KERNEL_OK")
</pallas_src>

<mosaic_0001>
module attributes {stable_mosaic.version = 11 : i64} {
  func.func @_mae_kernel(%arg0: i32, %arg1: memref<2048x128xf32, #tpu.memory_space<vmem>>, %arg2: memref<2048x128xf32, #tpu.memory_space<vmem>>, %arg3: memref<2048x128xf32, #tpu.memory_space<vmem>>) attributes {dimension_semantics = [#tpu.dimension_semantics<parallel>], iteration_bounds = array<i64: 2>, scalar_prefetch = 0 : i64, scratch_operands = 0 : i64, tpu.core_type = #tpu.core_type<tc>, window_params = [{transform_indices = @transform_0, window_bounds = array<i64: 2048, 128>}, {transform_indices = @transform_1, window_bounds = array<i64: 2048, 128>}, {transform_indices = @transform_2, window_bounds = array<i64: 2048, 128>}]} {
    %c0 = arith.constant 0 : index
    %c0_0 = arith.constant 0 : index
    %0 = vector.load %arg1[%c0, %c0_0] : memref<2048x128xf32, #tpu.memory_space<vmem>>, vector<2048x128xf32>
    %c0_1 = arith.constant 0 : index
    %c0_2 = arith.constant 0 : index
    %1 = vector.load %arg2[%c0_1, %c0_2] : memref<2048x128xf32, #tpu.memory_space<vmem>>, vector<2048x128xf32>
    %2 = arith.subf %0, %1 : vector<2048x128xf32>
    %3 = math.absf %2 : vector<2048x128xf32>
    %c0_3 = arith.constant 0 : index
    %c0_4 = arith.constant 0 : index
    %4 = vector.load %arg3[%c0_3, %c0_4] : memref<2048x128xf32, #tpu.memory_space<vmem>>, vector<2048x128xf32>
    tpu.vector_store %arg3[%c0_3, %c0_4], %3 {strides = array<i32>} : memref<2048x128xf32, #tpu.memory_space<vmem>>, vector<2048x128xf32>,
    return
  }
  func.func @transform_0(%arg0: i32) -> (i32, i32) {
    %c0_i32 = arith.constant 0 : i32
    %c0_i32_0 = arith.constant 0 : i32
    return %arg0, %c0_i32 : i32, i32
  }
  func.func @transform_1(%arg0: i32) -> (i32, i32) {
    %c0_i32 = arith.constant 0 : i32
    %c0_i32_0 = arith.constant 0 : i32
    return %arg0, %c0_i32 : i32, i32
  }
  func.func @transform_2(%arg0: i32) -> (i32, i32) {
    %c0_i32 = arith.constant 0 : i32
    %c0_i32_0 = arith.constant 0 : i32
    return %arg0, %c0_i32 : i32, i32
  }
}

</mosaic_0001>

<bundles_post_ra>
// kernel: tpu_custom_call.1
= control target key start
LH: loop header
LB: loop body
LE: loop exit
PB: predicated region body
PF: predicated region fallthrough
CT: control target
= control target key end

     0   :  { %7 = vsyncpa [#allocation3], 0  ;;  %s2852_s0 = inlined_call_operand.hbm [shape: f32[2050,128], index: 0, kind: input, shape index: {}]   ;;  %s2853_s1 = inlined_call_operand.hbm [shape: f32[2050,128], index: 1, kind: input, shape index: {}]   ;;  %s2854_s2 = inlined_call_operand.hbm [shape: f32[2050,128], index: 2, kind: output, shape index: {}]  }
   0x1   :  { %9 = vsyncpa [#allocation3 + $0x1], 0 }
   0x2   :  { %10 = vsyncpa [#allocation6], 0 }
   0x3   :  { %12 = vsyncpa [#allocation6 + $0x1], 0 }
   0x4   :  { %13 = vsyncpa [#allocation4], 0 }
   0x5   :  { %15 = vsyncpa [#allocation4 + $0x1], 0  ;;  %s1850_s9 = smov 0   ;;  %s1852_s10 = smov 0  }
   0x6   :  { %s1854_s11 = smov 0   ;;  %s1856_s12 = smov 0  }
   0x7 LB: > { %s1871_s13 = sadd.s32 4294967295, %s1824_s12   ;;  %s1625_s14 = sadd.s32 4294967294, %s1824_s12   ;;  %s1824_s12 = sphi %s1856_s12, %s2866_s12   ;;  %s1820_s11 = sphi %s1854_s11, %s2865_s11   ;;  %s1816_s10 = sphi %s1852_s10, %s2864_s10   ;;  %s1812_s9 = sphi %s1850_s9, %s2863_s9  }
   0x8   : > { %s1875_s15 = sadd.s32 1, %s1824_s12   ;;  %s28_s16 = sadd.s32 1, %s1820_s11 }
   0x9   : > { %s25_s17 = ssub.s32 %s1824_s12, %s1875_s15  ;;  %p35_p0 = scmp.ne.s32.totalorder %s1820_s11, %s1816_s10 }
   0xa   : > { %p26_p1 = scmp.eq.s32.totalorder %s25_s17, 0  ;;  %p36_p2 = scmp.eq.s32.totalorder %s1824_s12, 0 }
   0xb   : > { %p41_p3 = scmp.ne.s32.totalorder %s1816_s10, %s1812_s9  ;;  %p42_p4 = scmp.eq.s32.totalorder %s1871_s13, 0 }
   0xc   : > { %s1887_s18 = scalar_select %p26_p1, %s1820_s11, %s28_s16  }
   0xd   : > { %p1889_p5 = por %p36_p2, %p35_p0  ;;  %p1893_p6 = por %p42_p4, %p41_p3 }
   0xe   : > { %p91_p7 = scmp.eq.s32.totalorder %s1871_s13, 1  ;;  %p97_p8 = scmp.eq.s32.totalorder %s1625_s14, 1 }
   0xf   : > { %p2855_p11 = scmp.ge.s32.totalorder %s1824_s12, 2 }
  0x10   : > { %p1898_p9 = por %p91_p7, %p35_p0  ;;  %p1902_p10 = por %p97_p8, %p41_p3 }
  0x11   : > { %113 = sbr.rel (%p2855_p11) target bundleno = 86 (0x56), region = 16 }
  0x12   : > { %s2858_s21 = scalar_select %p1898_p9, 1, 0 }
  0x13   : > { %s2859_s22 = scalar_select %p1902_p10, 1, 0 }
  0x16   : > { %116 = sbr.rel (!%p1889_p5) target bundleno = 54 (0x36), region = 20  ;;  %s117_s23 = sand.u32 (%p1889_p5), 1, %s1820_s11  }
  0x17   : > { %s1629_s24 = sshll.u32 (%p1889_p5), %s1824_s12, 8  ;;  %s1628_s25 = sshll.u32 (%p1889_p5), %s117_s23, 11 }
  0x18   : > { %s123_s26 = ssub.s32 (%p1889_p5), 257, %s1629_s24  ;;  %s1916_s29 = scalar_lea.sflag (%p1889_p5), [#allocation3], %s117_s23 }
  0x19   : > { %p124_p12 = scmp.lt.s32.totalorder (%p1889_p5), %s123_s26, 256  ;;  %s121_s30 = scalar_lea.vmem (%p1889_p5), [#allocation2], %s1628_s25 }
  0x1b   : > { %s2868_s26 = smov (!%p124_p12, %s123_s26), 256 }
  0x1c   : > { %s1913_s27 = sshll.u32 %s2868_s26, 7 }
  0x1d   : > { %s128_s28 = ssub.s32 32768, %s1913_s27 }
  0x1e   : > { %129 = vsyncadd %s1916_s29, %s128_s28  ;;  %p1631_p13 = scmp.ne.s32.totalorder %s1913_s27, 0  ;;  %s1655_s3 = sshll.u32 %s1824_s12, 15 }
  0x1f   : > { %s1924_s6 = scalar_lea.hbm %s2852_s0, %s1655_s3  ;;  %s134_s7 = sshll.u32 %s121_s30, 4  ;;  %s1926_s7 = int_to_ptr.vmem [resolvable:$true] %s134_s7 }
  0x20   : > { %s1704_s8 = scalar_lea.hbm %s1924_s6, %s1913_s27  ;;  %s1708_s17 = scalar_lea.hbm %s2852_s0, 32896 }
  0x21   : > { %p1705_p0 = scmp.ne.s32.totalorder %s1924_s6, %s1704_s8  ;;  %p1709_p3 = scmp.lt.s32.totalorder %s1924_s6, %s2852_s0 }
  0x22   : > { %p1710_p4 = scmp.lt.s32.totalorder %s1708_s17, %s1704_s8 }
  0x23   : > { %p1706_p1 = pnand %p1705_p0, %p1631_p13 }
  0x24   : > { %p1711_p7 = por %p1710_p4, %p1709_p3 }
  0x25   : > { %p1707_p2 = pneg %p1706_p1 }
  0x27   : > { %p1712_p8 = pnand %p1711_p7, %p1707_p2 }
  0x29   : > { %1715 = shalt.err (!%p1712_p8)
}
  0x2a   : > { %s1716_s25 = scalar_lea.vmem %s1926_s7, %s1913_s27  ;;  %s1826_s26 = smov [#allocation2]  }
  0x2b   : > { %p1717_p12 = scmp.ne.s32.totalorder %s1926_s7, %s1716_s25  ;;  %s1720_s28 = sshll.u32 %s1826_s26, 4  ;;  %s1721_s28 = int_to_ptr.vmem [resolvable:$false] %s1720_s28 }
  0x2c   : > { %s1722_s30 = scalar_lea.vmem %s1721_s28, 65536  ;;  %p1723_p11 = scmp.lt.s32.totalorder %s1926_s7, %s1721_s28 }
  0x2d   : > { %p1718_p0 = pnand %p1717_p12, %p1631_p13  ;;  %p1724_p10 = scmp.lt.s32.totalorder %s1722_s30, %s1716_s25 }
  0x2f   : > { %p1719_p1 = pneg %p1718_p0  ;;  %p1725_p9 = por %p1724_p10, %p1723_p11 }
  0x31   : > { %p1726_p3 = pnand %p1725_p9, %p1719_p1 }
  0x33   : > { %1729 = shalt.err (!%p1726_p3)
}
  0x34   : > { %s1827_s3 = smov 128   ;;  %s1828_s4 = smov 8  }
  0x35   : > { %140 = dma.hbm_to_vmem [thread:$0]  (%p1631_p13), %s1924_s6, %s1913_s27, %s1926_s7, %s1916_s29, %s1827_s3, %s1827_s3, %s1828_s4  }
  0x36 PF: > { %143 = sbr.rel (!%p1889_p5) target bundleno = 86 (0x56), region = 24  ;;  %s144_s5 = sand.u32 (%p1889_p5), 1, %s1820_s11  }
  0x37   : > { %s1636_s8 = sshll.u32 (%p1889_p5), %s1824_s12, 8  ;;  %s1635_s14 = sshll.u32 (%p1889_p5), %s144_s5, 11 }
  0x38   : > { %s150_s16 = ssub.s32 (%p1889_p5), 257, %s1636_s8  ;;  %s1959_s24 = scalar_lea.sflag (%p1889_p5), [#allocation6], %s144_s5 }
  0x39   : > { %p151_p9 = scmp.lt.s32.totalorder (%p1889_p5), %s150_s16, 256  ;;  %s148_s27 = scalar_lea.vmem (%p1889_p5), [#allocation5], %s1635_s14 }
  0x3b   : > { %s2870_s16 = smov (!%p151_p9, %s150_s16), 256 }
  0x3c   : > { %s1956_s17 = sshll.u32 %s2870_s16, 7 }
  0x3d   : > { %s155_s23 = ssub.s32 32768, %s1956_s17 }
  0x3e   : > { %156 = vsyncadd %s1959_s24, %s155_s23  ;;  %p1638_p5 = scmp.ne.s32.totalorder %s1956_s17, 0  ;;  %s1656_s19 = sshll.u32 %s1824_s12, 15 }
  0x3f   : > { %s1967_s7 = scalar_lea.hbm %s2853_s1, %s1656_s19  ;;  %s161_s25 = sshll.u32 %s148_s27, 4  ;;  %s1969_s25 = int_to_ptr.vmem [resolvable:$true] %s161_s25 }
  0x40   : > { %s1730_s26 = scalar_lea.hbm %s1967_s7, %s1956_s17  ;;  %s1734_s3 = scalar_lea.hbm %s2853_s1, 32896 }
  0x41   : > { %p1731_p10 = scmp.ne.s32.totalorder %s1967_s7, %s1730_s26  ;;  %p1735_p2 = scmp.lt.s32.totalorder %s1967_s7, %s2853_s1 }
  0x42   : > { %p1736_p4 = scmp.lt.s32.totalorder %s1734_s3, %s1730_s26 }
  0x43   : > { %p1732_p11 = pnand %p1731_p10, %p1638_p5 }
  0x44   : > { %p1737_p7 = por %p1736_p4, %p1735_p2 }
  0x45   : > { %p1733_p13 = pneg %p1732_p11 }
  0x47   : > { %p1738_p8 = pnand %p1737_p7, %p1733_p13 }
  0x49   : > { %1741 = shalt.err (!%p1738_p8)
}
  0x4a   : > { %s1742_s8 = scalar_lea.vmem %s1969_s25, %s1956_s17  ;;  %s1829_s14 = smov [#allocation5]  }
  0x4b   : > { %p1743_p12 = scmp.ne.s32.totalorder %s1969_s25, %s1742_s8  ;;  %s1746_s16 = sshll.u32 %s1829_s14, 4  ;;  %s1747_s16 = int_to_ptr.vmem [resolvable:$false] %s1746_s16 }
  0x4c   : > { %s1748_s23 = scalar_lea.vmem %s1747_s16, 65536  ;;  %p1749_p3 = scmp.lt.s32.totalorder %s1969_s25, %s1747_s16 }
  0x4d   : > { %p1744_p0 = pnand %p1743_p12, %p1638_p5  ;;  %p1750_p9 = scmp.lt.s32.totalorder %s1748_s23, %s1742_s8 }
  0x4f   : > { %p1745_p1 = pneg %p1744_p0  ;;  %p1751_p10 = por %p1750_p9, %p1749_p3 }
  0x51   : > { %p1752_p11 = pnand %p1751_p10, %p1745_p1 }
  0x53   : > { %1755 = shalt.err (!%p1752_p11)
}
  0x54   : > { %s1830_s27 = smov 128   ;;  %s1831_s19 = smov 8  }
  0x55   : > { %167 = dma.hbm_to_vmem [thread:$0]  (%p1638_p5), %s1967_s7, %s1956_s17, %s1969_s25, %s1959_s24, %s1830_s27, %s1830_s27, %s1831_s19  }
  0x56 PF: > { %p1642_p13 = scmp.ge.s32.totalorder %s1824_s12, 1  ;;  %p169_p2 = scmp.lt.s32.totalorder %s1824_s12, 3 }
  0x58   : > { %p170_p4 = pnand %p1642_p13, %p169_p2 }
  0x59   : > { %s1998_s29 = sand.u32 (!%p170_p4), 1, %s1816_s10  }
  0x5a   : > { %173 = sbr.rel (%p170_p4) target bundleno = 354 (0x162), region = 28  ;;  %s2001_s6 = sshll.u32 (!%p170_p4), %s1998_s29, 11 }
  0x5b   : > { %s176_s26 = scalar_lea.sflag (!%p170_p4), [#allocation3], %s1998_s29  ;;  %s2005_s28 = scalar_lea.vmem (!%p170_p4), [#allocation2], %s2001_s6 }
  0x5f   : > { %1799 = dma.done.wait (%p1893_p6), %s176_s26, 32768  }
  0x60   : > { %1801 = vsyncadd (%p1893_p6), %s176_s26, 4294934528  ;;  %s185_s17 = scalar_lea.sflag [#allocation6], %s1998_s29  ;;  %s2013_s24 = scalar_lea.vmem [#allocation5], %s2001_s6 }
  0x61   : > { %1803 = dma.done.wait (%p1893_p6), %s185_s17, 32768  }
  0x62   : > { %1805 = vsyncadd (%p1893_p6), %s185_s17, 4294934528  ;;  %v229_v0 = vld [vmem:[%s2005_s28] sm:$0xff]  ;;  %v230_v2 = vld [vmem:[%s2005_s28 + $0x8] sm:$0xff]  ;;  %s2034_s20 = scalar_lea.vmem [#allocation7], %s2001_s6  ;;  %s1510_s7 = scalar_lea.sflag [#allocation4], %s1998_s29 }
  0x63   : > { %v485_v1 = vld [vmem:[%s2013_s24] sm:$0xff]  ;;  %v486_v4 = vld [vmem:[%s2013_s24 + $0x8] sm:$0xff]  ;;  %v231_v5 = vld [vmem:[%s2005_s28 + $0x10] sm:$0xff]  ;;  %p2860_p6 = scmp.ne.s32.totalorder %s2858_s21, 0 }
  0x64   : > { %v741_v3 = vsub.f32 %v229_v0, %v485_v1  ;;  %v487_v6 = vld [vmem:[%s2013_s24 + $0x10] sm:$0xff]  ;;  %v742_v7 = vsub.f32 %v230_v2, %v486_v4  ;;  %v232_v9 = vld [vmem:[%s2005_s28 + $0x18] sm:$0xff]  ;;  %v233_v11 = vld [vmem:[%s2005_s28 + $0x20] sm:$0xff]  ;;  %s1647_s25 = sshll.u32 (%p2860_p6), %s1871_s13, 8 }
  0x65   : > { %v743_v8 = vsub.f32 %v231_v5, %v487_v6  ;;  %v488_v10 = vld [vmem:[%s2013_s24 + $0x18] sm:$0xff]  ;;  %v489_v14 = vld [vmem:[%s2013_s24 + $0x20] sm:$0xff]  ;;  %v234_v15 = vld [vmem:[%s2005_s28 + $0x28] sm:$0xff]  ;;  %s1518_s30 = ssub.s32 (%p2860_p6), 257, %s1647_s25 }
  0x66   : > { %v997_v12 = vand.u32 2147483647, %v741_v3  ;;  %v744_v13 = vsub.f32 %v232_v9, %v488_v10  ;;  %v490_v16 = vld [vmem:[%s2013_s24 + $0x28] sm:$0xff]  ;;  %v998_v17 = vand.u32 2147483647, %v742_v7  ;;  %v745_v19 = vsub.f32 %v233_v11, %v489_v14  ;;  %v235_v21 = vld [vmem:[%s2005_s28 + $0x30] sm:$0xff] }
  0x67   : > { %v999_v18 = vand.u32 2147483647, %v743_v8  ;;  %v746_v20 = vsub.f32 %v234_v15, %v490_v16  ;;  %v491_v22 = vld [vmem:[%s2013_s24 + $0x30] sm:$0xff]  ;;  %v236_v25 = vld [vmem:[%s2005_s28 + $0x38] sm:$0xff]  ;;  %v237_v27 = vld [vmem:[%s2005_s28 + $0x40] sm:$0xff]  ;;  %p1519_p5 = scmp.lt.s32.totalorder (%p2860_p6), %s1518_s30, 256 }
  0x68   : > { %1253 = vst [vmem:[%s2034_s20] sm:$0xff] %v997_v12  ;;  %v1000_v23 = vand.u32 2147483647, %v744_v13  ;;  %v747_v24 = vsub.f32 %v235_v21, %v491_v22  ;;  %v492_v26 = vld [vmem:[%s2013_s24 + $0x38] sm:$0xff]  ;;  %1254 = vst [vmem:[%s2034_s20 + $0x8] sm:$0xff] %v998_v17  ;;  %v1001_v28 = vand.u32 2147483647, %v745_v19 }
  0x69   : > { %1255 = vst [vmem:[%s2034_s20 + $0x10] sm:$0xff] %v999_v18  ;;  %v1002_v29 = vand.u32 2147483647, %v746_v20  ;;  %v748_v30 = vsub.f32 %v236_v25, %v492_v26  ;;  %v493_v31 = vld [vmem:[%s2013_s24 + $0x40] sm:$0xff]  ;;  %v238_v32 = vld [vmem:[%s2005_s28 + $0x48] sm:$0xff]  ;;  %v239_v36 = vld [vmem:[%s2005_s28 + $0x50] sm:$0xff] }
  0x6a   : > { %1256 = vst [vmem:[%s2034_s20 + $0x18] sm:$0xff] %v1000_v23  ;;  %v1003_v33 = vand.u32 2147483647, %v747_v24  ;;  %v749_v34 = vsub.f32 %v237_v27, %v493_v31  ;;  %v494_v35 = vld [vmem:[%s2013_s24 + $0x48] sm:$0xff]  ;;  %v495_v37 = vld [vmem:[%s2013_s24 + $0x50] sm:$0xff]  ;;  %1257 = vst [vmem:[%s2034_s20 + $0x20] sm:$0xff] %v1001_v28 }
  0x6b   : > { %1258 = vst [vmem:[%s2034_s20 + $0x28] sm:$0xff] %v1002_v29  ;;  %v1004_v38 = vand.u32 2147483647, %v748_v30  ;;  %v750_v39 = vsub.f32 %v238_v32, %v494_v35  ;;  %v751_v40 = vsub.f32 %v239_v36, %v495_v37  ;;  %v240_v41 = vld [vmem:[%s2005_s28 + $0x58] sm:$0xff]  ;;  %v241_v43 = vld [vmem:[%s2005_s28 + $0x60] sm:$0xff]  ;;  %v242_v47 = vld [vmem:[%s2005_s28 + $0x68] sm:$0xff] }
  0x6c   : > { %v496_v42 = vld [vmem:[%s2013_s24 + $0x58] sm:$0xff]  ;;  %1259 = vst [vmem:[%s2034_s20 + $0x30] sm:$0xff] %v1003_v33  ;;  %v1005_v44 = vand.u32 2147483647, %v749_v34  ;;  %v497_v46 = vld [vmem:[%s2013_s24 + $0x60] sm:$0xff]  ;;  %v498_v48 = vld [vmem:[%s2013_s24 + $0x68] sm:$0xff] }
  0x6d   : > { %v752_v45 = vsub.f32 %v240_v41, %v496_v42  ;;  %1260 = vst [vmem:[%s2034_s20 + $0x38] sm:$0xff] %v1004_v38  ;;  %v1006_v49 = vand.u32 2147483647, %v750_v39  ;;  %v1007_v50 = vand.u32 2147483647, %v751_v40  ;;  %v753_v51 = vsub.f32 %v241_v43, %v497_v46  ;;  %v243_v53 = vld [vmem:[%s2005_s28 + $0x70] sm:$0xff] }
  0x6e   : > { %v754_v52 = vsub.f32 %v242_v47, %v498_v48  ;;  %v499_v54 = vld [vmem:[%s2013_s24 + $0x70] sm:$0xff]  ;;  %1261 = vst [vmem:[%s2034_s20 + $0x40] sm:$0xff] %v1005_v44  ;;  %v244_v57 = vld [vmem:[%s2005_s28 + $0x78] sm:$0xff]  ;;  %v245_v59 = vld [vmem:[%s2005_s28 + $0x80] sm:$0xff] }
  0x6f   : > { %v1008_v55 = vand.u32 2147483647, %v752_v45  ;;  %v755_v56 = vsub.f32 %v243_v53, %v499_v54  ;;  %v500_v58 = vld [vmem:[%s2013_s24 + $0x78] sm:$0xff]  ;;  %1262 = vst [vmem:[%s2034_s20 + $0x48] sm:$0xff] %v1006_v49  ;;  %1263 = vst [vmem:[%s2034_s20 + $0x50] sm:$0xff] %v1007_v50  ;;  %v501_v63 = vld [vmem:[%s2013_s24 + $0x80] sm:$0xff] }
  0x70   : > { %v1009_v60 = vand.u32 2147483647, %v753_v51  ;;  %v1010_v61 = vand.u32 2147483647, %v754_v52  ;;  %v756_v62 = vsub.f32 %v244_v57, %v500_v58  ;;  %v246_v0 = vld [vmem:[%s2005_s28 + $0x88] sm:$0xff]  ;;  %v757_v2 = vsub.f32 %v245_v59, %v501_v63  ;;  %v247_v4 = vld [vmem:[%s2005_s28 + $0x90] sm:$0xff] }
  0x71   : > { %1264 = vst [vmem:[%s2034_s20 + $0x58] sm:$0xff] %v1008_v55  ;;  %v1011_v1 = vand.u32 2147483647, %v755_v56  ;;  %v502_v3 = vld [vmem:[%s2013_s24 + $0x88] sm:$0xff]  ;;  %v503_v5 = vld [vmem:[%s2013_s24 + $0x90] sm:$0xff]  ;;  %v248_v9 = vld [vmem:[%s2005_s28 + $0x98] sm:$0xff] }
  0x72   : > { %1265 = vst [vmem:[%s2034_s20 + $0x60] sm:$0xff] %v1009_v60  ;;  %1266 = vst [vmem:[%s2034_s20 + $0x68] sm:$0xff] %v1010_v61  ;;  %v1012_v6 = vand.u32 2147483647, %v756_v62  ;;  %v758_v7 = vsub.f32 %v246_v0, %v502_v3  ;;  %v759_v8 = vsub.f32 %v247_v4, %v503_v5  ;;  %v504_v10 = vld [vmem:[%s2013_s24 + $0x98] sm:$0xff]  ;;  %v249_v11 = vld [vmem:[%s2005_s28 + $0xa0] sm:$0xff] }
  0x73   : > { %1267 = vst [vmem:[%s2034_s20 + $0x70] sm:$0xff] %v1011_v1  ;;  %v1013_v12 = vand.u32 2147483647, %v757_v2  ;;  %v760_v13 = vsub.f32 %v248_v9, %v504_v10  ;;  %v505_v14 = vld [vmem:[%s2013_s24 + $0xa0] sm:$0xff]  ;;  %v250_v15 = vld [vmem:[%s2005_s28 + $0xa8] sm:$0xff]  ;;  %v251_v21 = vld [vmem:[%s2005_s28 + $0xb0] sm:$0xff] }
  0x74   : > { %v506_v16 = vld [vmem:[%s2013_s24 + $0xa8] sm:$0xff]  ;;  %1268 = vst [vmem:[%s2034_s20 + $0x78] sm:$0xff] %v1012_v6  ;;  %v1014_v17 = vand.u32 2147483647, %v758_v7  ;;  %v1015_v18 = vand.u32 2147483647, %v759_v8  ;;  %v761_v19 = vsub.f32 %v249_v11, %v505_v14 }
  0x75   : > { %v762_v20 = vsub.f32 %v250_v15, %v506_v16  ;;  %v507_v22 = vld [vmem:[%s2013_s24 + $0xb0] sm:$0xff]  ;;  %1269 = vst [vmem:[%s2034_s20 + $0x80] sm:$0xff] %v1013_v12  ;;  %v1016_v23 = vand.u32 2147483647, %v760_v13  ;;  %v252_v25 = vld [vmem:[%s2005_s28 + $0xb8] sm:$0xff]  ;;  %v253_v27 = vld [vmem:[%s2005_s28 + $0xc0] sm:$0xff] }
  0x76   : > { %v763_v24 = vsub.f32 %v251_v21, %v507_v22  ;;  %v508_v26 = vld [vmem:[%s2013_s24 + $0xb8] sm:$0xff]  ;;  %1270 = vst [vmem:[%s2034_s20 + $0x88] sm:$0xff] %v1014_v17  ;;  %1271 = vst [vmem:[%s2034_s20 + $0x90] sm:$0xff] %v1015_v18  ;;  %v1017_v28 = vand.u32 2147483647, %v761_v19  ;;  %v509_v31 = vld [vmem:[%s2013_s24 + $0xc0] sm:$0xff] }
  0x77   : > { %v1018_v29 = vand.u32 2147483647, %v762_v20  ;;  %v764_v30 = vsub.f32 %v252_v25, %v508_v26  ;;  %v254_v32 = vld [vmem:[%s2005_s28 + $0xc8] sm:$0xff]  ;;  %1272 = vst [vmem:[%s2034_s20 + $0x98] sm:$0xff] %v1016_v23  ;;  %v765_v34 = vsub.f32 %v253_v27, %v509_v31  ;;  %v255_v36 = vld [vmem:[%s2005_s28 + $0xd0] sm:$0xff]  ;;  %v256_v41 = vld [vmem:[%s2005_s28 + $0xd8] sm:$0xff] }
  0x78   : > { %v1019_v33 = vand.u32 2147483647, %v763_v24  ;;  %v510_v35 = vld [vmem:[%s2013_s24 + $0xc8] sm:$0xff]  ;;  %v511_v37 = vld [vmem:[%s2013_s24 + $0xd0] sm:$0xff]  ;;  %1273 = vst [vmem:[%s2034_s20 + $0xa0] sm:$0xff] %v1017_v28  ;;  %v512_v42 = vld [vmem:[%s2013_s24 + $0xd8] sm:$0xff] }
  0x79   : > { %1274 = vst [vmem:[%s2034_s20 + $0xa8] sm:$0xff] %v1018_v29  ;;  %v1020_v38 = vand.u32 2147483647, %v764_v30  ;;  %v766_v39 = vsub.f32 %v254_v32, %v510_v35  ;;  %v767_v40 = vsub.f32 %v255_v36, %v511_v37  ;;  %v257_v43 = vld [vmem:[%s2005_s28 + $0xe0] sm:$0xff]  ;;  %v1021_v44 = vand.u32 2147483647, %v765_v34 }
  0x7a   : > { %1275 = vst [vmem:[%s2034_s20 + $0xb0] sm:$0xff] %v1019_v33  ;;  %v768_v45 = vsub.f32 %v256_v41, %v512_v42  ;;  %v513_v46 = vld [vmem:[%s2013_s24 + $0xe0] sm:$0xff]  ;;  %v258_v47 = vld [vmem:[%s2005_s28 + $0xe8] sm:$0xff]  ;;  %v259_v53 = vld [vmem:[%s2005_s28 + $0xf0] sm:$0xff] }
  0x7b   : > { %v514_v48 = vld [vmem:[%s2013_s24 + $0xe8] sm:$0xff]  ;;  %1276 = vst [vmem:[%s2034_s20 + $0xb8] sm:$0xff] %v1020_v38  ;;  %v1022_v49 = vand.u32 2147483647, %v766_v39  ;;  %v1023_v50 = vand.u32 2147483647, %v767_v40  ;;  %v769_v51 = vsub.f32 %v257_v43, %v513_v46 }
  0x7c   : > { %v770_v52 = vsub.f32 %v258_v47, %v514_v48  ;;  %v515_v54 = vld [vmem:[%s2013_s24 + $0xf0] sm:$0xff]  ;;  %1277 = vst [vmem:[%s2034_s20 + $0xc0] sm:$0xff] %v1021_v44  ;;  %v1024_v55 = vand.u32 2147483647, %v768_v45  ;;  %v260_v57 = vld [vmem:[%s2005_s28 + $0xf8] sm:$0xff]  ;;  %v261_v59 = vld [vmem:[%s2005_s28 + $0x100] sm:$0xff] }
  0x7d   : > { %v771_v56 = vsub.f32 %v259_v53, %v515_v54  ;;  %v516_v58 = vld [vmem:[%s2013_s24 + $0xf8] sm:$0xff]  ;;  %1278 = vst [vmem:[%s2034_s20 + $0xc8] sm:$0xff] %v1022_v49  ;;  %1279 = vst [vmem:[%s2034_s20 + $0xd0] sm:$0xff] %v1023_v50  ;;  %v1025_v60 = vand.u32 2147483647, %v769_v51  ;;  %v517_v63 = vld [vmem:[%s2013_s24 + $0x100] sm:$0xff] }
  0x7e   : > { %v1026_v61 = vand.u32 2147483647, %v770_v52  ;;  %v772_v62 = vsub.f32 %v260_v57, %v516_v58  ;;  %v262_v0 = vld [vmem:[%s2005_s28 + $0x108] sm:$0xff]  ;;  %1280 = vst [vmem:[%s2034_s20 + $0xd8] sm:$0xff] %v1024_v55  ;;  %v773_v2 = vsub.f32 %v261_v59, %v517_v63  ;;  %v263_v4 = vld [vmem:[%s2005_s28 + $0x110] sm:$0xff]  ;;  %v264_v9 = vld [vmem:[%s2005_s28 + $0x118] sm:$0xff] }
  0x7f   : > { %v1027_v1 = vand.u32 2147483647, %v771_v56  ;;  %v518_v3 = vld [vmem:[%s2013_s24 + $0x108] sm:$0xff]  ;;  %v519_v5 = vld [vmem:[%s2013_s24 + $0x110] sm:$0xff]  ;;  %1281 = vst [vmem:[%s2034_s20 + $0xe0] sm:$0xff] %v1025_v60  ;;  %v520_v10 = vld [vmem:[%s2013_s24 + $0x118] sm:$0xff] }
  0x80   : > { %1282 = vst [vmem:[%s2034_s20 + $0xe8] sm:$0xff] %v1026_v61  ;;  %v1028_v6 = vand.u32 2147483647, %v772_v62  ;;  %v774_v7 = vsub.f32 %v262_v0, %v518_v3  ;;  %v775_v8 = vsub.f32 %v263_v4, %v519_v5  ;;  %v265_v11 = vld [vmem:[%s2005_s28 + $0x120] sm:$0xff]  ;;  %v1029_v12 = vand.u32 2147483647, %v773_v2 }
  0x81   : > { %1283 = vst [vmem:[%s2034_s20 + $0xf0] sm:$0xff] %v1027_v1  ;;  %v776_v13 = vsub.f32 %v264_v9, %v520_v10  ;;  %v521_v14 = vld [vmem:[%s2013_s24 + $0x120] sm:$0xff]  ;;  %v266_v15 = vld [vmem:[%s2005_s28 + $0x128] sm:$0xff]  ;;  %v267_v21 = vld [vmem:[%s2005_s28 + $0x130] sm:$0xff] }
  0x82   : > { %v522_v16 = vld [vmem:[%s2013_s24 + $0x128] sm:$0xff]  ;;  %1284 = vst [vmem:[%s2034_s20 + $0xf8] sm:$0xff] %v1028_v6  ;;  %v1030_v17 = vand.u32 2147483647, %v774_v7  ;;  %v1031_v18 = vand.u32 2147483647, %v775_v8  ;;  %v777_v19 = vsub.f32 %v265_v11, %v521_v14 }
  0x83   : > { %v778_v20 = vsub.f32 %v266_v15, %v522_v16  ;;  %v523_v22 = vld [vmem:[%s2013_s24 + $0x130] sm:$0xff]  ;;  %1285 = vst [vmem:[%s2034_s20 + $0x100] sm:$0xff] %v1029_v12  ;;  %v1032_v23 = vand.u32 2147483647, %v776_v13  ;;  %v268_v25 = vld [vmem:[%s2005_s28 + $0x138] sm:$0xff]  ;;  %v269_v27 = vld [vmem:[%s2005_s28 + $0x140] sm:$0xff] }
  0x84   : > { %v779_v24 = vsub.f32 %v267_v21, %v523_v22  ;;  %v524_v26 = vld [vmem:[%s2013_s24 + $0x138] sm:$0xff]  ;;  %1286 = vst [vmem:[%s2034_s20 + $0x108] sm:$0xff] %v1030_v17  ;;  %1287 = vst [vmem:[%s2034_s20 + $0x110] sm:$0xff] %v1031_v18  ;;  %v1033_v28 = vand.u32 2147483647, %v777_v19  ;;  %v525_v31 = vld [vmem:[%s2013_s24 + $0x140] sm:$0xff] }
  0x85   : > { %v1034_v29 = vand.u32 2147483647, %v778_v20  ;;  %v780_v30 = vsub.f32 %v268_v25, %v524_v26  ;;  %v270_v32 = vld [vmem:[%s2005_s28 + $0x148] sm:$0xff]  ;;  %1288 = vst [vmem:[%s2034_s20 + $0x118] sm:$0xff] %v1032_v23  ;;  %v781_v34 = vsub.f32 %v269_v27, %v525_v31  ;;  %v271_v36 = vld [vmem:[%s2005_s28 + $0x150] sm:$0xff]  ;;  %v272_v41 = vld [vmem:[%s2005_s28 + $0x158] sm:$0xff] }
  0x86   : > { %v1035_v33 = vand.u32 2147483647, %v779_v24  ;;  %v526_v35 = vld [vmem:[%s2013_s24 + $0x148] sm:$0xff]  ;;  %v527_v37 = vld [vmem:[%s2013_s24 + $0x150] sm:$0xff]  ;;  %1289 = vst [vmem:[%s2034_s20 + $0x120] sm:$0xff] %v1033_v28  ;;  %v528_v42 = vld [vmem:[%s2013_s24 + $0x158] sm:$0xff] }
  0x87   : > { %1290 = vst [vmem:[%s2034_s20 + $0x128] sm:$0xff] %v1034_v29  ;;  %v1036_v38 = vand.u32 2147483647, %v780_v30  ;;  %v782_v39 = vsub.f32 %v270_v32, %v526_v35  ;;  %v783_v40 = vsub.f32 %v271_v36, %v527_v37  ;;  %v273_v43 = vld [vmem:[%s2005_s28 + $0x160] sm:$0xff]  ;;  %v1037_v44 = vand.u32 2147483647, %v781_v34 }
  0x88   : > { %1291 = vst [vmem:[%s2034_s20 + $0x130] sm:$0xff] %v1035_v33  ;;  %v784_v45 = vsub.f32 %v272_v41, %v528_v42  ;;  %v529_v46 = vld [vmem:[%s2013_s24 + $0x160] sm:$0xff]  ;;  %v274_v47 = vld [vmem:[%s2005_s28 + $0x168] sm:$0xff]  ;;  %v275_v53 = vld [vmem:[%s2005_s28 + $0x170] sm:$0xff] }
  0x89   : > { %v530_v48 = vld [vmem:[%s2013_s24 + $0x168] sm:$0xff]  ;;  %1292 = vst [vmem:[%s2034_s20 + $0x138] sm:$0xff] %v1036_v38  ;;  %v1038_v49 = vand.u32 2147483647, %v782_v39  ;;  %v1039_v50 = vand.u32 2147483647, %v783_v40  ;;  %v785_v51 = vsub.f32 %v273_v43, %v529_v46 }
  0x8a   : > { %v786_v52 = vsub.f32 %v274_v47, %v530_v48  ;;  %v531_v54 = vld [vmem:[%s2013_s24 + $0x170] sm:$0xff]  ;;  %1293 = vst [vmem:[%s2034_s20 + $0x140] sm:$0xff] %v1037_v44  ;;  %v1040_v55 = vand.u32 2147483647, %v784_v45  ;;  %v276_v57 = vld [vmem:[%s2005_s28 + $0x178] sm:$0xff]  ;;  %v277_v59 = vld [vmem:[%s2005_s28 + $0x180] sm:$0xff] }
  0x8b   : > { %v787_v56 = vsub.f32 %v275_v53, %v531_v54  ;;  %v532_v58 = vld [vmem:[%s2013_s24 + $0x178] sm:$0xff]  ;;  %1294 = vst [vmem:[%s2034_s20 + $0x148] sm:$0xff] %v1038_v49  ;;  %1295 = vst [vmem:[%s2034_s20 + $0x150] sm:$0xff] %v1039_v50  ;;  %v1041_v60 = vand.u32 2147483647, %v785_v51  ;;  %v533_v63 = vld [vmem:[%s2013_s24 + $0x180] sm:$0xff] }
  0x8c   : > { %v1042_v61 = vand.u32 2147483647, %v786_v52  ;;  %v788_v62 = vsub.f32 %v276_v57, %v532_v58  ;;  %v278_v0 = vld [vmem:[%s2005_s28 + $0x188] sm:$0xff]  ;;  %1296 = vst [vmem:[%s2034_s20 + $0x158] sm:$0xff] %v1040_v55  ;;  %v789_v2 = vsub.f32 %v277_v59, %v533_v63  ;;  %v279_v4 = vld [vmem:[%s2005_s28 + $0x190] sm:$0xff]  ;;  %v280_v9 = vld [vmem:[%s2005_s28 + $0x198] sm:$0xff] }
  0x8d   : > { %v1043_v1 = vand.u32 2147483647, %v787_v56  ;;  %v534_v3 = vld [vmem:[%s2013_s24 + $0x188] sm:$0xff]  ;;  %v535_v5 = vld [vmem:[%s2013_s24 + $0x190] sm:$0xff]  ;;  %1297 = vst [vmem:[%s2034_s20 + $0x160] sm:$0xff] %v1041_v60  ;;  %v536_v10 = vld [vmem:[%s2013_s24 + $0x198] sm:$0xff] }
  0x8e   : > { %1298 = vst [vmem:[%s2034_s20 + $0x168] sm:$0xff] %v1042_v61  ;;  %v1044_v6 = vand.u32 2147483647, %v788_v62  ;;  %v790_v7 = vsub.f32 %v278_v0, %v534_v3  ;;  %v791_v8 = vsub.f32 %v279_v4, %v535_v5  ;;  %v281_v11 = vld [vmem:[%s2005_s28 + $0x1a0] sm:$0xff]  ;;  %v1045_v12 = vand.u32 2147483647, %v789_v2 }
  0x8f   : > { %1299 = vst [vmem:[%s2034_s20 + $0x170] sm:$0xff] %v1043_v1  ;;  %v792_v13 = vsub.f32 %v280_v9, %v536_v10  ;;  %v537_v14 = vld [vmem:[%s2013_s24 + $0x1a0] sm:$0xff]  ;;  %v282_v15 = vld [vmem:[%s2005_s28 + $0x1a8] sm:$0xff]  ;;  %v283_v21 = vld [vmem:[%s2005_s28 + $0x1b0] sm:$0xff] }
  0x90   : > { %v538_v16 = vld [vmem:[%s2013_s24 + $0x1a8] sm:$0xff]  ;;  %1300 = vst [vmem:[%s2034_s20 + $0x178] sm:$0xff] %v1044_v6  ;;  %v1046_v17 = vand.u32 2147483647, %v790_v7  ;;  %v1047_v18 = vand.u32 2147483647, %v791_v8  ;;  %v793_v19 = vsub.f32 %v281_v11, %v537_v14 }
  0x91   : > { %v794_v20 = vsub.f32 %v282_v15, %v538_v16  ;;  %v539_v22 = vld [vmem:[%s2013_s24 + $0x1b0] sm:$0xff]  ;;  %1301 = vst [vmem:[%s2034_s20 + $0x180] sm:$0xff] %v1045_v12  ;;  %v1048_v23 = vand.u32 2147483647, %v792_v13  ;;  %v284_v25 = vld [vmem:[%s2005_s28 + $0x1b8] sm:$0xff]  ;;  %v285_v27 = vld [vmem:[%s2005_s28 + $0x1c0] sm:$0xff] }
  0x92   : > { %v795_v24 = vsub.f32 %v283_v21, %v539_v22  ;;  %v540_v26 = vld [vmem:[%s2013_s24 + $0x1b8] sm:$0xff]  ;;  %1302 = vst [vmem:[%s2034_s20 + $0x188] sm:$0xff] %v1046_v17  ;;  %1303 = vst [vmem:[%s2034_s20 + $0x190] sm:$0xff] %v1047_v18  ;;  %v1049_v28 = vand.u32 2147483647, %v793_v19  ;;  %v541_v31 = vld [vmem:[%s2013_s24 + $0x1c0] sm:$0xff] }
  0x93   : > { %v1050_v29 = vand.u32 2147483647, %v794_v20  ;;  %v796_v30 = vsub.f32 %v284_v25, %v540_v26  ;;  %v286_v32 = vld [vmem:[%s2005_s28 + $0x1c8] sm:$0xff]  ;;  %1304 = vst [vmem:[%s2034_s20 + $0x198] sm:$0xff] %v1048_v23  ;;  %v797_v34 = vsub.f32 %v285_v27, %v541_v31  ;;  %v287_v36 = vld [vmem:[%s2005_s28 + $0x1d0] sm:$0xff]  ;;  %v288_v41 = vld [vmem:[%s2005_s28 + $0x1d8] sm:$0xff] }
  0x94   : > { %v1051_v33 = vand.u32 2147483647, %v795_v24  ;;  %v542_v35 = vld [vmem:[%s2013_s24 + $0x1c8] sm:$0xff]  ;;  %v543_v37 = vld [vmem:[%s2013_s24 + $0x1d0] sm:$0xff]  ;;  %1305 = vst [vmem:[%s2034_s20 + $0x1a0] sm:$0xff] %v1049_v28  ;;  %v544_v42 = vld [vmem:[%s2013_s24 + $0x1d8] sm:$0xff] }
  0x95   : > { %1306 = vst [vmem:[%s2034_s20 + $0x1a8] sm:$0xff] %v1050_v29  ;;  %v1052_v38 = vand.u32 2147483647, %v796_v30  ;;  %v798_v39 = vsub.f32 %v286_v32, %v542_v35  ;;  %v799_v40 = vsub.f32 %v287_v36, %v543_v37  ;;  %v289_v43 = vld [vmem:[%s2005_s28 + $0x1e0] sm:$0xff]  ;;  %v1053_v44 = vand.u32 2147483647, %v797_v34 }
  0x96   : > { %1307 = vst [vmem:[%s2034_s20 + $0x1b0] sm:$0xff] %v1051_v33  ;;  %v800_v45 = vsub.f32 %v288_v41, %v544_v42  ;;  %v545_v46 = vld [vmem:[%s2013_s24 + $0x1e0] sm:$0xff]  ;;  %v290_v47 = vld [vmem:[%s2005_s28 + $0x1e8] sm:$0xff]  ;;  %v291_v53 = vld [vmem:[%s2005_s28 + $0x1f0] sm:$0xff] }
  0x97   : > { %v546_v48 = vld [vmem:[%s2013_s24 + $0x1e8] sm:$0xff]  ;;  %1308 = vst [vmem:[%s2034_s20 + $0x1b8] sm:$0xff] %v1052_v38  ;;  %v1054_v49 = vand.u32 2147483647, %v798_v39  ;;  %v1055_v50 = vand.u32 2147483647, %v799_v40  ;;  %v801_v51 = vsub.f32 %v289_v43, %v545_v46 }
  0x98   : > { %v802_v52 = vsub.f32 %v290_v47, %v546_v48  ;;  %v547_v54 = vld [vmem:[%s2013_s24 + $0x1f0] sm:$0xff]  ;;  %1309 = vst [vmem:[%s2034_s20 + $0x1c0] sm:$0xff] %v1053_v44  ;;  %v1056_v55 = vand.u32 2147483647, %v800_v45  ;;  %v292_v57 = vld [vmem:[%s2005_s28 + $0x1f8] sm:$0xff]  ;;  %v293_v59 = vld [vmem:[%s2005_s28 + $0x200] sm:$0xff] }
  0x99   : > { %v803_v56 = vsub.f32 %v291_v53, %v547_v54  ;;  %v548_v58 = vld [vmem:[%s2013_s24 + $0x1f8] sm:$0xff]  ;;  %1310 = vst [vmem:[%s2034_s20 + $0x1c8] sm:$0xff] %v1054_v49  ;;  %1311 = vst [vmem:[%s2034_s20 + $0x1d0] sm:$0xff] %v1055_v50  ;;  %v1057_v60 = vand.u32 2147483647, %v801_v51  ;;  %v549_v63 = vld [vmem:[%s2013_s24 + $0x200] sm:$0xff] }
  0x9a   : > { %v1058_v61 = vand.u32 2147483647, %v802_v52  ;;  %v804_v62 = vsub.f32 %v292_v57, %v548_v58  ;;  %v294_v0 = vld [vmem:[%s2005_s28 + $0x208] sm:$0xff]  ;;  %1312 = vst [vmem:[%s2034_s20 + $0x1d8] sm:$0xff] %v1056_v55  ;;  %v805_v2 = vsub.f32 %v293_v59, %v549_v63  ;;  %v295_v4 = vld [vmem:[%s2005_s28 + $0x210] sm:$0xff]  ;;  %v296_v9 = vld [vmem:[%s2005_s28 + $0x218] sm:$0xff] }
  0x9b   : > { %v1059_v1 = vand.u32 2147483647, %v803_v56  ;;  %v550_v3 = vld [vmem:[%s2013_s24 + $0x208] sm:$0xff]  ;;  %v551_v5 = vld [vmem:[%s2013_s24 + $0x210] sm:$0xff]  ;;  %1313 = vst [vmem:[%s2034_s20 + $0x1e0] sm:$0xff] %v1057_v60  ;;  %v552_v10 = vld [vmem:[%s2013_s24 + $0x218] sm:$0xff] }
  0x9c   : > { %1314 = vst [vmem:[%s2034_s20 + $0x1e8] sm:$0xff] %v1058_v61  ;;  %v1060_v6 = vand.u32 2147483647, %v804_v62  ;;  %v806_v7 = vsub.f32 %v294_v0, %v550_v3  ;;  %v807_v8 = vsub.f32 %v295_v4, %v551_v5  ;;  %v297_v11 = vld [vmem:[%s2005_s28 + $0x220] sm:$0xff]  ;;  %v1061_v12 = vand.u32 2147483647, %v805_v2 }
  0x9d   : > { %1315 = vst [vmem:[%s2034_s20 + $0x1f0] sm:$0xff] %v1059_v1  ;;  %v808_v13 = vsub.f32 %v296_v9, %v552_v10  ;;  %v553_v14 = vld [vmem:[%s2013_s24 + $0x220] sm:$0xff]  ;;  %v298_v15 = vld [vmem:[%s2005_s28 + $0x228] sm:$0xff]  ;;  %v299_v21 = vld [vmem:[%s2005_s28 + $0x230] sm:$0xff] }
  0x9e   : > { %v554_v16 = vld [vmem:[%s2013_s24 + $0x228] sm:$0xff]  ;;  %1316 = vst [vmem:[%s2034_s20 + $0x1f8] sm:$0xff] %v1060_v6  ;;  %v1062_v17 = vand.u32 2147483647, %v806_v7  ;;  %v1063_v18 = vand.u32 2147483647, %v807_v8  ;;  %v809_v19 = vsub.f32 %v297_v11, %v553_v14 }
  0x9f   : > { %v810_v20 = vsub.f32 %v298_v15, %v554_v16  ;;  %v555_v22 = vld [vmem:[%s2013_s24 + $0x230] sm:$0xff]  ;;  %1317 = vst [vmem:[%s2034_s20 + $0x200] sm:$0xff] %v1061_v12  ;;  %v1064_v23 = vand.u32 2147483647, %v808_v13  ;;  %v300_v25 = vld [vmem:[%s2005_s28 + $0x238] sm:$0xff]  ;;  %v301_v27 = vld [vmem:[%s2005_s28 + $0x240] sm:$0xff] }
  0xa0   : > { %v811_v24 = vsub.f32 %v299_v21, %v555_v22  ;;  %v556_v26 = vld [vmem:[%s2013_s24 + $0x238] sm:$0xff]  ;;  %1318 = vst [vmem:[%s2034_s20 + $0x208] sm:$0xff] %v1062_v17  ;;  %1319 = vst [vmem:[%s2034_s20 + $0x210] sm:$0xff] %v1063_v18  ;;  %v1065_v28 = vand.u32 2147483647, %v809_v19  ;;  %v557_v31 = vld [vmem:[%s2013_s24 + $0x240] sm:$0xff] }
  0xa1   : > { %v1066_v29 = vand.u32 2147483647, %v810_v20  ;;  %v812_v30 = vsub.f32 %v300_v25, %v556_v26  ;;  %v302_v32 = vld [vmem:[%s2005_s28 + $0x248] sm:$0xff]  ;;  %1320 = vst [vmem:[%s2034_s20 + $0x218] sm:$0xff] %v1064_v23  ;;  %v813_v34 = vsub.f32 %v301_v27, %v557_v31  ;;  %v303_v36 = vld [vmem:[%s2005_s28 + $0x250] sm:$0xff]  ;;  %v304_v41 = vld [vmem:[%s2005_s28 + $0x258] sm:$0xff] }
  0xa2   : > { %v1067_v33 = vand.u32 2147483647, %v811_v24  ;;  %v558_v35 = vld [vmem:[%s2013_s24 + $0x248] sm:$0xff]  ;;  %v559_v37 = vld [vmem:[%s2013_s24 + $0x250] sm:$0xff]  ;;  %1321 = vst [vmem:[%s2034_s20 + $0x220] sm:$0xff] %v1065_v28  ;;  %v560_v42 = vld [vmem:[%s2013_s24 + $0x258] sm:$0xff] }
  0xa3   : > { %1322 = vst [vmem:[%s2034_s20 + $0x228] sm:$0xff] %v1066_v29  ;;  %v1068_v38 = vand.u32 2147483647, %v812_v30  ;;  %v814_v39 = vsub.f32 %v302_v32, %v558_v35  ;;  %v815_v40 = vsub.f32 %v303_v36, %v559_v37  ;;  %v305_v43 = vld [vmem:[%s2005_s28 + $0x260] sm:$0xff]  ;;  %v1069_v44 = vand.u32 2147483647, %v813_v34 }
  0xa4   : > { %1323 = vst [vmem:[%s2034_s20 + $0x230] sm:$0xff] %v1067_v33  ;;  %v816_v45 = vsub.f32 %v304_v41, %v560_v42  ;;  %v561_v46 = vld [vmem:[%s2013_s24 + $0x260] sm:$0xff]  ;;  %v306_v47 = vld [vmem:[%s2005_s28 + $0x268] sm:$0xff]  ;;  %v307_v53 = vld [vmem:[%s2005_s28 + $0x270] sm:$0xff] }
  0xa5   : > { %v562_v48 = vld [vmem:[%s2013_s24 + $0x268] sm:$0xff]  ;;  %1324 = vst [vmem:[%s2034_s20 + $0x238] sm:$0xff] %v1068_v38  ;;  %v1070_v49 = vand.u32 2147483647, %v814_v39  ;;  %v1071_v50 = vand.u32 2147483647, %v815_v40  ;;  %v817_v51 = vsub.f32 %v305_v43, %v561_v46 }
  0xa6   : > { %v818_v52 = vsub.f32 %v306_v47, %v562_v48  ;;  %v563_v54 = vld [vmem:[%s2013_s24 + $0x270] sm:$0xff]  ;;  %1325 = vst [vmem:[%s2034_s20 + $0x240] sm:$0xff] %v1069_v44  ;;  %v1072_v55 = vand.u32 2147483647, %v816_v45  ;;  %v308_v57 = vld [vmem:[%s2005_s28 + $0x278] sm:$0xff]  ;;  %v309_v59 = vld [vmem:[%s2005_s28 + $0x280] sm:$0xff] }
  0xa7   : > { %v819_v56 = vsub.f32 %v307_v53, %v563_v54  ;;  %v564_v58 = vld [vmem:[%s2013_s24 + $0x278] sm:$0xff]  ;;  %1326 = vst [vmem:[%s2034_s20 + $0x248] sm:$0xff] %v1070_v49  ;;  %1327 = vst [vmem:[%s2034_s20 + $0x250] sm:$0xff] %v1071_v50  ;;  %v1073_v60 = vand.u32 2147483647, %v817_v51  ;;  %v565_v63 = vld [vmem:[%s2013_s24 + $0x280] sm:$0xff] }
  0xa8   : > { %v1074_v61 = vand.u32 2147483647, %v818_v52  ;;  %v820_v62 = vsub.f32 %v308_v57, %v564_v58  ;;  %v310_v0 = vld [vmem:[%s2005_s28 + $0x288] sm:$0xff]  ;;  %1328 = vst [vmem:[%s2034_s20 + $0x258] sm:$0xff] %v1072_v55  ;;  %v821_v2 = vsub.f32 %v309_v59, %v565_v63  ;;  %v311_v4 = vld [vmem:[%s2005_s28 + $0x290] sm:$0xff]  ;;  %v312_v9 = vld [vmem:[%s2005_s28 + $0x298] sm:$0xff] }
  0xa9   : > { %v1075_v1 = vand.u32 2147483647, %v819_v56  ;;  %v566_v3 = vld [vmem:[%s2013_s24 + $0x288] sm:$0xff]  ;;  %v567_v5 = vld [vmem:[%s2013_s24 + $0x290] sm:$0xff]  ;;  %1329 = vst [vmem:[%s2034_s20 + $0x260] sm:$0xff] %v1073_v60  ;;  %v568_v10 = vld [vmem:[%s2013_s24 + $0x298] sm:$0xff] }
  0xaa   : > { %1330 = vst [vmem:[%s2034_s20 + $0x268] sm:$0xff] %v1074_v61  ;;  %v1076_v6 = vand.u32 2147483647, %v820_v62  ;;  %v822_v7 = vsub.f32 %v310_v0, %v566_v3  ;;  %v823_v8 = vsub.f32 %v311_v4, %v567_v5  ;;  %v313_v11 = vld [vmem:[%s2005_s28 + $0x2a0] sm:$0xff]  ;;  %v1077_v12 = vand.u32 2147483647, %v821_v2 }
  0xab   : > { %1331 = vst [vmem:[%s2034_s20 + $0x270] sm:$0xff] %v1075_v1  ;;  %v824_v13 = vsub.f32 %v312_v9, %v568_v10  ;;  %v569_v14 = vld [vmem:[%s2013_s24 + $0x2a0] sm:$0xff]  ;;  %v314_v15 = vld [vmem:[%s2005_s28 + $0x2a8] sm:$0xff]  ;;  %v315_v21 = vld [vmem:[%s2005_s28 + $0x2b0] sm:$0xff] }
  0xac   : > { %v570_v16 = vld [vmem:[%s2013_s24 + $0x2a8] sm:$0xff]  ;;  %1332 = vst [vmem:[%s2034_s20 + $0x278] sm:$0xff] %v1076_v6  ;;  %v1078_v17 = vand.u32 2147483647, %v822_v7  ;;  %v1079_v18 = vand.u32 2147483647, %v823_v8  ;;  %v825_v19 = vsub.f32 %v313_v11, %v569_v14 }
  0xad   : > { %v826_v20 = vsub.f32 %v314_v15, %v570_v16  ;;  %v571_v22 = vld [vmem:[%s2013_s24 + $0x2b0] sm:$0xff]  ;;  %1333 = vst [vmem:[%s2034_s20 + $0x280] sm:$0xff] %v1077_v12  ;;  %v1080_v23 = vand.u32 2147483647, %v824_v13  ;;  %v316_v25 = vld [vmem:[%s2005_s28 + $0x2b8] sm:$0xff]  ;;  %v317_v27 = vld [vmem:[%s2005_s28 + $0x2c0] sm:$0xff] }
  0xae   : > { %v827_v24 = vsub.f32 %v315_v21, %v571_v22  ;;  %v572_v26 = vld [vmem:[%s2013_s24 + $0x2b8] sm:$0xff]  ;;  %1334 = vst [vmem:[%s2034_s20 + $0x288] sm:$0xff] %v1078_v17  ;;  %1335 = vst [vmem:[%s2034_s20 + $0x290] sm:$0xff] %v1079_v18  ;;  %v1081_v28 = vand.u32 2147483647, %v825_v19  ;;  %v573_v31 = vld [vmem:[%s2013_s24 + $0x2c0] sm:$0xff] }
  0xaf   : > { %v1082_v29 = vand.u32 2147483647, %v826_v20  ;;  %v828_v30 = vsub.f32 %v316_v25, %v572_v26  ;;  %v318_v32 = vld [vmem:[%s2005_s28 + $0x2c8] sm:$0xff]  ;;  %1336 = vst [vmem:[%s2034_s20 + $0x298] sm:$0xff] %v1080_v23  ;;  %v829_v34 = vsub.f32 %v317_v27, %v573_v31  ;;  %v319_v36 = vld [vmem:[%s2005_s28 + $0x2d0] sm:$0xff]  ;;  %v320_v41 = vld [vmem:[%s2005_s28 + $0x2d8] sm:$0xff] }
  0xb0   : > { %v1083_v33 = vand.u32 2147483647, %v827_v24  ;;  %v574_v35 = vld [vmem:[%s2013_s24 + $0x2c8] sm:$0xff]  ;;  %v575_v37 = vld [vmem:[%s2013_s24 + $0x2d0] sm:$0xff]  ;;  %1337 = vst [vmem:[%s2034_s20 + $0x2a0] sm:$0xff] %v1081_v28  ;;  %v576_v42 = vld [vmem:[%s2013_s24 + $0x2d8] sm:$0xff] }
  0xb1   : > { %1338 = vst [vmem:[%s2034_s20 + $0x2a8] sm:$0xff] %v1082_v29  ;;  %v1084_v38 = vand.u32 2147483647, %v828_v30  ;;  %v830_v39 = vsub.f32 %v318_v32, %v574_v35  ;;  %v831_v40 = vsub.f32 %v319_v36, %v575_v37  ;;  %v321_v43 = vld [vmem:[%s2005_s28 + $0x2e0] sm:$0xff]  ;;  %v1085_v44 = vand.u32 2147483647, %v829_v34 }
  0xb2   : > { %1339 = vst [vmem:[%s2034_s20 + $0x2b0] sm:$0xff] %v1083_v33  ;;  %v832_v45 = vsub.f32 %v320_v41, %v576_v42  ;;  %v577_v46 = vld [vmem:[%s2013_s24 + $0x2e0] sm:$0xff]  ;;  %v322_v47 = vld [vmem:[%s2005_s28 + $0x2e8] sm:$0xff]  ;;  %v323_v53 = vld [vmem:[%s2005_s28 + $0x2f0] sm:$0xff] }
  0xb3   : > { %v578_v48 = vld [vmem:[%s2013_s24 + $0x2e8] sm:$0xff]  ;;  %1340 = vst [vmem:[%s2034_s20 + $0x2b8] sm:$0xff] %v1084_v38  ;;  %v1086_v49 = vand.u32 2147483647, %v830_v39  ;;  %v1087_v50 = vand.u32 2147483647, %v831_v40  ;;  %v833_v51 = vsub.f32 %v321_v43, %v577_v46 }
  0xb4   : > { %v834_v52 = vsub.f32 %v322_v47, %v578_v48  ;;  %v579_v54 = vld [vmem:[%s2013_s24 + $0x2f0] sm:$0xff]  ;;  %1341 = vst [vmem:[%s2034_s20 + $0x2c0] sm:$0xff] %v1085_v44  ;;  %v1088_v55 = vand.u32 2147483647, %v832_v45  ;;  %v324_v57 = vld [vmem:[%s2005_s28 + $0x2f8] sm:$0xff]  ;;  %v325_v59 = vld [vmem:[%s2005_s28 + $0x300] sm:$0xff] }
  0xb5   : > { %v835_v56 = vsub.f32 %v323_v53, %v579_v54  ;;  %v580_v58 = vld [vmem:[%s2013_s24 + $0x2f8] sm:$0xff]  ;;  %1342 = vst [vmem:[%s2034_s20 + $0x2c8] sm:$0xff] %v1086_v49  ;;  %1343 = vst [vmem:[%s2034_s20 + $0x2d0] sm:$0xff] %v1087_v50  ;;  %v1089_v60 = vand.u32 2147483647, %v833_v51  ;;  %v581_v63 = vld [vmem:[%s2013_s24 + $0x300] sm:$0xff] }
  0xb6   : > { %v1090_v61 = vand.u32 2147483647, %v834_v52  ;;  %v836_v62 = vsub.f32 %v324_v57, %v580_v58  ;;  %v326_v0 = vld [vmem:[%s2005_s28 + $0x308] sm:$0xff]  ;;  %1344 = vst [vmem:[%s2034_s20 + $0x2d8] sm:$0xff] %v1088_v55  ;;  %v837_v2 = vsub.f32 %v325_v59, %v581_v63  ;;  %v327_v4 = vld [vmem:[%s2005_s28 + $0x310] sm:$0xff]  ;;  %v328_v9 = vld [vmem:[%s2005_s28 + $0x318] sm:$0xff] }
  0xb7   : > { %v1091_v1 = vand.u32 2147483647, %v835_v56  ;;  %v582_v3 = vld [vmem:[%s2013_s24 + $0x308] sm:$0xff]  ;;  %v583_v5 = vld [vmem:[%s2013_s24 + $0x310] sm:$0xff]  ;;  %1345 = vst [vmem:[%s2034_s20 + $0x2e0] sm:$0xff] %v1089_v60  ;;  %v584_v10 = vld [vmem:[%s2013_s24 + $0x318] sm:$0xff] }
  0xb8   : > { %1346 = vst [vmem:[%s2034_s20 + $0x2e8] sm:$0xff] %v1090_v61  ;;  %v1092_v6 = vand.u32 2147483647, %v836_v62  ;;  %v838_v7 = vsub.f32 %v326_v0, %v582_v3  ;;  %v839_v8 = vsub.f32 %v327_v4, %v583_v5  ;;  %v329_v11 = vld [vmem:[%s2005_s28 + $0x320] sm:$0xff]  ;;  %v1093_v12 = vand.u32 2147483647, %v837_v2 }
  0xb9   : > { %1347 = vst [vmem:[%s2034_s20 + $0x2f0] sm:$0xff] %v1091_v1  ;;  %v840_v13 = vsub.f32 %v328_v9, %v584_v10  ;;  %v585_v14 = vld [vmem:[%s2013_s24 + $0x320] sm:$0xff]  ;;  %v330_v15 = vld [vmem:[%s2005_s28 + $0x328] sm:$0xff]  ;;  %v331_v21 = vld [vmem:[%s2005_s28 + $0x330] sm:$0xff] }
  0xba   : > { %v586_v16 = vld [vmem:[%s2013_s24 + $0x328] sm:$0xff]  ;;  %1348 = vst [vmem:[%s2034_s20 + $0x2f8] sm:$0xff] %v1092_v6  ;;  %v1094_v17 = vand.u32 2147483647, %v838_v7  ;;  %v1095_v18 = vand.u32 2147483647, %v839_v8  ;;  %v841_v19 = vsub.f32 %v329_v11, %v585_v14 }
  0xbb   : > { %v842_v20 = vsub.f32 %v330_v15, %v586_v16  ;;  %v587_v22 = vld [vmem:[%s2013_s24 + $0x330] sm:$0xff]  ;;  %1349 = vst [vmem:[%s2034_s20 + $0x300] sm:$0xff] %v1093_v12  ;;  %v1096_v23 = vand.u32 2147483647, %v840_v13  ;;  %v332_v25 = vld [vmem:[%s2005_s28 + $0x338] sm:$0xff]  ;;  %v333_v27 = vld [vmem:[%s2005_s28 + $0x340] sm:$0xff] }
  0xbc   : > { %v843_v24 = vsub.f32 %v331_v21, %v587_v22  ;;  %v588_v26 = vld [vmem:[%s2013_s24 + $0x338] sm:$0xff]  ;;  %1350 = vst [vmem:[%s2034_s20 + $0x308] sm:$0xff] %v1094_v17  ;;  %1351 = vst [vmem:[%s2034_s20 + $0x310] sm:$0xff] %v1095_v18  ;;  %v1097_v28 = vand.u32 2147483647, %v841_v19  ;;  %v589_v31 = vld [vmem:[%s2013_s24 + $0x340] sm:$0xff] }
  0xbd   : > { %v1098_v29 = vand.u32 2147483647, %v842_v20  ;;  %v844_v30 = vsub.f32 %v332_v25, %v588_v26  ;;  %v334_v32 = vld [vmem:[%s2005_s28 + $0x348] sm:$0xff]  ;;  %1352 = vst [vmem:[%s2034_s20 + $0x318] sm:$0xff] %v1096_v23  ;;  %v845_v34 = vsub.f32 %v333_v27, %v589_v31  ;;  %v335_v36 = vld [vmem:[%s2005_s28 + $0x350] sm:$0xff]  ;;  %v336_v41 = vld [vmem:[%s2005_s28 + $0x358] sm:$0xff] }
  0xbe   : > { %v1099_v33 = vand.u32 2147483647, %v843_v24  ;;  %v590_v35 = vld [vmem:[%s2013_s24 + $0x348] sm:$0xff]  ;;  %v591_v37 = vld [vmem:[%s2013_s24 + $0x350] sm:$0xff]  ;;  %1353 = vst [vmem:[%s2034_s20 + $0x320] sm:$0xff] %v1097_v28  ;;  %v592_v42 = vld [vmem:[%s2013_s24 + $0x358] sm:$0xff] }
  0xbf   : > { %1354 = vst [vmem:[%s2034_s20 + $0x328] sm:$0xff] %v1098_v29  ;;  %v1100_v38 = vand.u32 2147483647, %v844_v30  ;;  %v846_v39 = vsub.f32 %v334_v32, %v590_v35  ;;  %v847_v40 = vsub.f32 %v335_v36, %v591_v37  ;;  %v337_v43 = vld [vmem:[%s2005_s28 + $0x360] sm:$0xff]  ;;  %v1101_v44 = vand.u32 2147483647, %v845_v34 }
  0xc0   : > { %1355 = vst [vmem:[%s2034_s20 + $0x330] sm:$0xff] %v1099_v33  ;;  %v848_v45 = vsub.f32 %v336_v41, %v592_v42  ;;  %v593_v46 = vld [vmem:[%s2013_s24 + $0x360] sm:$0xff]  ;;  %v338_v47 = vld [vmem:[%s2005_s28 + $0x368] sm:$0xff]  ;;  %v339_v53 = vld [vmem:[%s2005_s28 + $0x370] sm:$0xff] }
  0xc1   : > { %v594_v48 = vld [vmem:[%s2013_s24 + $0x368] sm:$0xff]  ;;  %1356 = vst [vmem:[%s2034_s20 + $0x338] sm:$0xff] %v1100_v38  ;;  %v1102_v49 = vand.u32 2147483647, %v846_v39  ;;  %v1103_v50 = vand.u32 2147483647, %v847_v40  ;;  %v849_v51 = vsub.f32 %v337_v43, %v593_v46 }
  0xc2   : > { %v850_v52 = vsub.f32 %v338_v47, %v594_v48  ;;  %v595_v54 = vld [vmem:[%s2013_s24 + $0x370] sm:$0xff]  ;;  %1357 = vst [vmem:[%s2034_s20 + $0x340] sm:$0xff] %v1101_v44  ;;  %v1104_v55 = vand.u32 2147483647, %v848_v45  ;;  %v340_v57 = vld [vmem:[%s2005_s28 + $0x378] sm:$0xff]  ;;  %v341_v59 = vld [vmem:[%s2005_s28 + $0x380] sm:$0xff] }
  0xc3   : > { %v851_v56 = vsub.f32 %v339_v53, %v595_v54  ;;  %v596_v58 = vld [vmem:[%s2013_s24 + $0x378] sm:$0xff]  ;;  %1358 = vst [vmem:[%s2034_s20 + $0x348] sm:$0xff] %v1102_v49  ;;  %1359 = vst [vmem:[%s2034_s20 + $0x350] sm:$0xff] %v1103_v50  ;;  %v1105_v60 = vand.u32 2147483647, %v849_v51  ;;  %v597_v63 = vld [vmem:[%s2013_s24 + $0x380] sm:$0xff] }
  0xc4   : > { %v1106_v61 = vand.u32 2147483647, %v850_v52  ;;  %v852_v62 = vsub.f32 %v340_v57, %v596_v58  ;;  %v342_v0 = vld [vmem:[%s2005_s28 + $0x388] sm:$0xff]  ;;  %1360 = vst [vmem:[%s2034_s20 + $0x358] sm:$0xff] %v1104_v55  ;;  %v853_v2 = vsub.f32 %v341_v59, %v597_v63  ;;  %v343_v4 = vld [vmem:[%s2005_s28 + $0x390] sm:$0xff]  ;;  %v344_v9 = vld [vmem:[%s2005_s28 + $0x398] sm:$0xff] }
  0xc5   : > { %v1107_v1 = vand.u32 2147483647, %v851_v56  ;;  %v598_v3 = vld [vmem:[%s2013_s24 + $0x388] sm:$0xff]  ;;  %v599_v5 = vld [vmem:[%s2013_s24 + $0x390] sm:$0xff]  ;;  %1361 = vst [vmem:[%s2034_s20 + $0x360] sm:$0xff] %v1105_v60  ;;  %v600_v10 = vld [vmem:[%s2013_s24 + $0x398] sm:$0xff] }
  0xc6   : > { %1362 = vst [vmem:[%s2034_s20 + $0x368] sm:$0xff] %v1106_v61  ;;  %v1108_v6 = vand.u32 2147483647, %v852_v62  ;;  %v854_v7 = vsub.f32 %v342_v0, %v598_v3  ;;  %v855_v8 = vsub.f32 %v343_v4, %v599_v5  ;;  %v345_v11 = vld [vmem:[%s2005_s28 + $0x3a0] sm:$0xff]  ;;  %v1109_v12 = vand.u32 2147483647, %v853_v2 }
  0xc7   : > { %1363 = vst [vmem:[%s2034_s20 + $0x370] sm:$0xff] %v1107_v1  ;;  %v856_v13 = vsub.f32 %v344_v9, %v600_v10  ;;  %v601_v14 = vld [vmem:[%s2013_s24 + $0x3a0] sm:$0xff]  ;;  %v346_v15 = vld [vmem:[%s2005_s28 + $0x3a8] sm:$0xff]  ;;  %v347_v21 = vld [vmem:[%s2005_s28 + $0x3b0] sm:$0xff] }
  0xc8   : > { %v602_v16 = vld [vmem:[%s2013_s24 + $0x3a8] sm:$0xff]  ;;  %1364 = vst [vmem:[%s2034_s20 + $0x378] sm:$0xff] %v1108_v6  ;;  %v1110_v17 = vand.u32 2147483647, %v854_v7  ;;  %v1111_v18 = vand.u32 2147483647, %v855_v8  ;;  %v857_v19 = vsub.f32 %v345_v11, %v601_v14 }
  0xc9   : > { %v858_v20 = vsub.f32 %v346_v15, %v602_v16  ;;  %v603_v22 = vld [vmem:[%s2013_s24 + $0x3b0] sm:$0xff]  ;;  %1365 = vst [vmem:[%s2034_s20 + $0x380] sm:$0xff] %v1109_v12  ;;  %v1112_v23 = vand.u32 2147483647, %v856_v13  ;;  %v348_v25 = vld [vmem:[%s2005_s28 + $0x3b8] sm:$0xff]  ;;  %v349_v27 = vld [vmem:[%s2005_s28 + $0x3c0] sm:$0xff] }
  0xca   : > { %v859_v24 = vsub.f32 %v347_v21, %v603_v22  ;;  %v604_v26 = vld [vmem:[%s2013_s24 + $0x3b8] sm:$0xff]  ;;  %1366 = vst [vmem:[%s2034_s20 + $0x388] sm:$0xff] %v1110_v17  ;;  %1367 = vst [vmem:[%s2034_s20 + $0x390] sm:$0xff] %v1111_v18  ;;  %v1113_v28 = vand.u32 2147483647, %v857_v19  ;;  %v605_v31 = vld [vmem:[%s2013_s24 + $0x3c0] sm:$0xff] }
  0xcb   : > { %v1114_v29 = vand.u32 2147483647, %v858_v20  ;;  %v860_v30 = vsub.f32 %v348_v25, %v604_v26  ;;  %v350_v32 = vld [vmem:[%s2005_s28 + $0x3c8] sm:$0xff]  ;;  %1368 = vst [vmem:[%s2034_s20 + $0x398] sm:$0xff] %v1112_v23  ;;  %v861_v34 = vsub.f32 %v349_v27, %v605_v31  ;;  %v351_v36 = vld [vmem:[%s2005_s28 + $0x3d0] sm:$0xff]  ;;  %v352_v41 = vld [vmem:[%s2005_s28 + $0x3d8] sm:$0xff] }
  0xcc   : > { %v1115_v33 = vand.u32 2147483647, %v859_v24  ;;  %v606_v35 = vld [vmem:[%s2013_s24 + $0x3c8] sm:$0xff]  ;;  %v607_v37 = vld [vmem:[%s2013_s24 + $0x3d0] sm:$0xff]  ;;  %1369 = vst [vmem:[%s2034_s20 + $0x3a0] sm:$0xff] %v1113_v28  ;;  %v608_v42 = vld [vmem:[%s2013_s24 + $0x3d8] sm:$0xff] }
  0xcd   : > { %1370 = vst [vmem:[%s2034_s20 + $0x3a8] sm:$0xff] %v1114_v29  ;;  %v1116_v38 = vand.u32 2147483647, %v860_v30  ;;  %v862_v39 = vsub.f32 %v350_v32, %v606_v35  ;;  %v863_v40 = vsub.f32 %v351_v36, %v607_v37  ;;  %v353_v43 = vld [vmem:[%s2005_s28 + $0x3e0] sm:$0xff]  ;;  %v1117_v44 = vand.u32 2147483647, %v861_v34 }
  0xce   : > { %1371 = vst [vmem:[%s2034_s20 + $0x3b0] sm:$0xff] %v1115_v33  ;;  %v864_v45 = vsub.f32 %v352_v41, %v608_v42  ;;  %v609_v46 = vld [vmem:[%s2013_s24 + $0x3e0] sm:$0xff]  ;;  %v354_v47 = vld [vmem:[%s2005_s28 + $0x3e8] sm:$0xff]  ;;  %v355_v53 = vld [vmem:[%s2005_s28 + $0x3f0] sm:$0xff] }
  0xcf   : > { %v610_v48 = vld [vmem:[%s2013_s24 + $0x3e8] sm:$0xff]  ;;  %1372 = vst [vmem:[%s2034_s20 + $0x3b8] sm:$0xff] %v1116_v38  ;;  %v1118_v49 = vand.u32 2147483647, %v862_v39  ;;  %v1119_v50 = vand.u32 2147483647, %v863_v40  ;;  %v865_v51 = vsub.f32 %v353_v43, %v609_v46 }
  0xd0   : > { %v866_v52 = vsub.f32 %v354_v47, %v610_v48  ;;  %v611_v54 = vld [vmem:[%s2013_s24 + $0x3f0] sm:$0xff]  ;;  %1373 = vst [vmem:[%s2034_s20 + $0x3c0] sm:$0xff] %v1117_v44  ;;  %v1120_v55 = vand.u32 2147483647, %v864_v45  ;;  %v356_v57 = vld [vmem:[%s2005_s28 + $0x3f8] sm:$0xff]  ;;  %v357_v59 = vld [vmem:[%s2005_s28 + $0x400] sm:$0xff] }
  0xd1   : > { %v867_v56 = vsub.f32 %v355_v53, %v611_v54  ;;  %v612_v58 = vld [vmem:[%s2013_s24 + $0x3f8] sm:$0xff]  ;;  %1374 = vst [vmem:[%s2034_s20 + $0x3c8] sm:$0xff] %v1118_v49  ;;  %1375 = vst [vmem:[%s2034_s20 + $0x3d0] sm:$0xff] %v1119_v50  ;;  %v1121_v60 = vand.u32 2147483647, %v865_v51  ;;  %v613_v63 = vld [vmem:[%s2013_s24 + $0x400] sm:$0xff] }
  0xd2   : > { %v1122_v61 = vand.u32 2147483647, %v866_v52  ;;  %v868_v62 = vsub.f32 %v356_v57, %v612_v58  ;;  %v358_v0 = vld [vmem:[%s2005_s28 + $0x408] sm:$0xff]  ;;  %1376 = vst [vmem:[%s2034_s20 + $0x3d8] sm:$0xff] %v1120_v55  ;;  %v869_v2 = vsub.f32 %v357_v59, %v613_v63  ;;  %v359_v4 = vld [vmem:[%s2005_s28 + $0x410] sm:$0xff]  ;;  %v360_v9 = vld [vmem:[%s2005_s28 + $0x418] sm:$0xff] }
  0xd3   : > { %v1123_v1 = vand.u32 2147483647, %v867_v56  ;;  %v614_v3 = vld [vmem:[%s2013_s24 + $0x408] sm:$0xff]  ;;  %v615_v5 = vld [vmem:[%s2013_s24 + $0x410] sm:$0xff]  ;;  %1377 = vst [vmem:[%s2034_s20 + $0x3e0] sm:$0xff] %v1121_v60  ;;  %v616_v10 = vld [vmem:[%s2013_s24 + $0x418] sm:$0xff] }
  0xd4   : > { %1378 = vst [vmem:[%s2034_s20 + $0x3e8] sm:$0xff] %v1122_v61  ;;  %v1124_v6 = vand.u32 2147483647, %v868_v62  ;;  %v870_v7 = vsub.f32 %v358_v0, %v614_v3  ;;  %v871_v8 = vsub.f32 %v359_v4, %v615_v5  ;;  %v361_v11 = vld [vmem:[%s2005_s28 + $0x420] sm:$0xff]  ;;  %v1125_v12 = vand.u32 2147483647, %v869_v2 }
  0xd5   : > { %1379 = vst [vmem:[%s2034_s20 + $0x3f0] sm:$0xff] %v1123_v1  ;;  %v872_v13 = vsub.f32 %v360_v9, %v616_v10  ;;  %v617_v14 = vld [vmem:[%s2013_s24 + $0x420] sm:$0xff]  ;;  %v362_v15 = vld [vmem:[%s2005_s28 + $0x428] sm:$0xff]  ;;  %v363_v21 = vld [vmem:[%s2005_s28 + $0x430] sm:$0xff] }
  0xd6   : > { %v618_v16 = vld [vmem:[%s2013_s24 + $0x428] sm:$0xff]  ;;  %1380 = vst [vmem:[%s2034_s20 + $0x3f8] sm:$0xff] %v1124_v6  ;;  %v1126_v17 = vand.u32 2147483647, %v870_v7  ;;  %v1127_v18 = vand.u32 2147483647, %v871_v8  ;;  %v873_v19 = vsub.f32 %v361_v11, %v617_v14 }
  0xd7   : > { %v874_v20 = vsub.f32 %v362_v15, %v618_v16  ;;  %v619_v22 = vld [vmem:[%s2013_s24 + $0x430] sm:$0xff]  ;;  %1381 = vst [vmem:[%s2034_s20 + $0x400] sm:$0xff] %v1125_v12  ;;  %v1128_v23 = vand.u32 2147483647, %v872_v13  ;;  %v364_v25 = vld [vmem:[%s2005_s28 + $0x438] sm:$0xff]  ;;  %v365_v27 = vld [vmem:[%s2005_s28 + $0x440] sm:$0xff] }
  0xd8   : > { %v875_v24 = vsub.f32 %v363_v21, %v619_v22  ;;  %v620_v26 = vld [vmem:[%s2013_s24 + $0x438] sm:$0xff]  ;;  %1382 = vst [vmem:[%s2034_s20 + $0x408] sm:$0xff] %v1126_v17  ;;  %1383 = vst [vmem:[%s2034_s20 + $0x410] sm:$0xff] %v1127_v18  ;;  %v1129_v28 = vand.u32 2147483647, %v873_v19  ;;  %v621_v31 = vld [vmem:[%s2013_s24 + $0x440] sm:$0xff] }
  0xd9   : > { %v1130_v29 = vand.u32 2147483647, %v874_v20  ;;  %v876_v30 = vsub.f32 %v364_v25, %v620_v26  ;;  %v366_v32 = vld [vmem:[%s2005_s28 + $0x448] sm:$0xff]  ;;  %1384 = vst [vmem:[%s2034_s20 + $0x418] sm:$0xff] %v1128_v23  ;;  %v877_v34 = vsub.f32 %v365_v27, %v621_v31  ;;  %v367_v36 = vld [vmem:[%s2005_s28 + $0x450] sm:$0xff]  ;;  %v368_v41 = vld [vmem:[%s2005_s28 + $0x458] sm:$0xff] }
  0xda   : > { %v1131_v33 = vand.u32 2147483647, %v875_v24  ;;  %v622_v35 = vld [vmem:[%s2013_s24 + $0x448] sm:$0xff]  ;;  %v623_v37 = vld [vmem:[%s2013_s24 + $0x450] sm:$0xff]  ;;  %1385 = vst [vmem:[%s2034_s20 + $0x420] sm:$0xff] %v1129_v28  ;;  %v624_v42 = vld [vmem:[%s2013_s24 + $0x458] sm:$0xff] }
  0xdb   : > { %1386 = vst [vmem:[%s2034_s20 + $0x428] sm:$0xff] %v1130_v29  ;;  %v1132_v38 = vand.u32 2147483647, %v876_v30  ;;  %v878_v39 = vsub.f32 %v366_v32, %v622_v35  ;;  %v879_v40 = vsub.f32 %v367_v36, %v623_v37  ;;  %v369_v43 = vld [vmem:[%s2005_s28 + $0x460] sm:$0xff]  ;;  %v1133_v44 = vand.u32 2147483647, %v877_v34 }
  0xdc   : > { %1387 = vst [vmem:[%s2034_s20 + $0x430] sm:$0xff] %v1131_v33  ;;  %v880_v45 = vsub.f32 %v368_v41, %v624_v42  ;;  %v625_v46 = vld [vmem:[%s2013_s24 + $0x460] sm:$0xff]  ;;  %v370_v47 = vld [vmem:[%s2005_s28 + $0x468] sm:$0xff]  ;;  %v371_v53 = vld [vmem:[%s2005_s28 + $0x470] sm:$0xff] }
  0xdd   : > { %v626_v48 = vld [vmem:[%s2013_s24 + $0x468] sm:$0xff]  ;;  %1388 = vst [vmem:[%s2034_s20 + $0x438] sm:$0xff] %v1132_v38  ;;  %v1134_v49 = vand.u32 2147483647, %v878_v39  ;;  %v1135_v50 = vand.u32 2147483647, %v879_v40  ;;  %v881_v51 = vsub.f32 %v369_v43, %v625_v46 }
  0xde   : > { %v882_v52 = vsub.f32 %v370_v47, %v626_v48  ;;  %v627_v54 = vld [vmem:[%s2013_s24 + $0x470] sm:$0xff]  ;;  %1389 = vst [vmem:[%s2034_s20 + $0x440] sm:$0xff] %v1133_v44  ;;  %v1136_v55 = vand.u32 2147483647, %v880_v45  ;;  %v372_v57 = vld [vmem:[%s2005_s28 + $0x478] sm:$0xff]  ;;  %v373_v59 = vld [vmem:[%s2005_s28 + $0x480] sm:$0xff] }
  0xdf   : > { %v883_v56 = vsub.f32 %v371_v53, %v627_v54  ;;  %v628_v58 = vld [vmem:[%s2013_s24 + $0x478] sm:$0xff]  ;;  %1390 = vst [vmem:[%s2034_s20 + $0x448] sm:$0xff] %v1134_v49  ;;  %1391 = vst [vmem:[%s2034_s20 + $0x450] sm:$0xff] %v1135_v50  ;;  %v1137_v60 = vand.u32 2147483647, %v881_v51  ;;  %v629_v63 = vld [vmem:[%s2013_s24 + $0x480] sm:$0xff] }
  0xe0   : > { %v1138_v61 = vand.u32 2147483647, %v882_v52  ;;  %v884_v62 = vsub.f32 %v372_v57, %v628_v58  ;;  %v374_v0 = vld [vmem:[%s2005_s28 + $0x488] sm:$0xff]  ;;  %1392 = vst [vmem:[%s2034_s20 + $0x458] sm:$0xff] %v1136_v55  ;;  %v885_v2 = vsub.f32 %v373_v59, %v629_v63  ;;  %v375_v4 = vld [vmem:[%s2005_s28 + $0x490] sm:$0xff]  ;;  %v376_v9 = vld [vmem:[%s2005_s28 + $0x498] sm:$0xff] }
  0xe1   : > { %v1139_v1 = vand.u32 2147483647, %v883_v56  ;;  %v630_v3 = vld [vmem:[%s2013_s24 + $0x488] sm:$0xff]  ;;  %v631_v5 = vld [vmem:[%s2013_s24 + $0x490] sm:$0xff]  ;;  %1393 = vst [vmem:[%s2034_s20 + $0x460] sm:$0xff] %v1137_v60  ;;  %v632_v10 = vld [vmem:[%s2013_s24 + $0x498] sm:$0xff] }
  0xe2   : > { %1394 = vst [vmem:[%s2034_s20 + $0x468] sm:$0xff] %v1138_v61  ;;  %v1140_v6 = vand.u32 2147483647, %v884_v62  ;;  %v886_v7 = vsub.f32 %v374_v0, %v630_v3  ;;  %v887_v8 = vsub.f32 %v375_v4, %v631_v5  ;;  %v377_v11 = vld [vmem:[%s2005_s28 + $0x4a0] sm:$0xff]  ;;  %v1141_v12 = vand.u32 2147483647, %v885_v2 }
  0xe3   : > { %1395 = vst [vmem:[%s2034_s20 + $0x470] sm:$0xff] %v1139_v1  ;;  %v888_v13 = vsub.f32 %v376_v9, %v632_v10  ;;  %v633_v14 = vld [vmem:[%s2013_s24 + $0x4a0] sm:$0xff]  ;;  %v378_v15 = vld [vmem:[%s2005_s28 + $0x4a8] sm:$0xff]  ;;  %v379_v21 = vld [vmem:[%s2005_s28 + $0x4b0] sm:$0xff] }
  0xe4   : > { %v634_v16 = vld [vmem:[%s2013_s24 + $0x4a8] sm:$0xff]  ;;  %1396 = vst [vmem:[%s2034_s20 + $0x478] sm:$0xff] %v1140_v6  ;;  %v1142_v17 = vand.u32 2147483647, %v886_v7  ;;  %v1143_v18 = vand.u32 2147483647, %v887_v8  ;;  %v889_v19 = vsub.f32 %v377_v11, %v633_v14 }
  0xe5   : > { %v890_v20 = vsub.f32 %v378_v15, %v634_v16  ;;  %v635_v22 = vld [vmem:[%s2013_s24 + $0x4b0] sm:$0xff]  ;;  %1397 = vst [vmem:[%s2034_s20 + $0x480] sm:$0xff] %v1141_v12  ;;  %v1144_v23 = vand.u32 2147483647, %v888_v13  ;;  %v380_v25 = vld [vmem:[%s2005_s28 + $0x4b8] sm:$0xff]  ;;  %v381_v27 = vld [vmem:[%s2005_s28 + $0x4c0] sm:$0xff] }
  0xe6   : > { %v891_v24 = vsub.f32 %v379_v21, %v635_v22  ;;  %v636_v26 = vld [vmem:[%s2013_s24 + $0x4b8] sm:$0xff]  ;;  %1398 = vst [vmem:[%s2034_s20 + $0x488] sm:$0xff] %v1142_v17  ;;  %1399 = vst [vmem:[%s2034_s20 + $0x490] sm:$0xff] %v1143_v18  ;;  %v1145_v28 = vand.u32 2147483647, %v889_v19  ;;  %v637_v31 = vld [vmem:[%s2013_s24 + $0x4c0] sm:$0xff] }
  0xe7   : > { %v1146_v29 = vand.u32 2147483647, %v890_v20  ;;  %v892_v30 = vsub.f32 %v380_v25, %v636_v26  ;;  %v382_v32 = vld [vmem:[%s2005_s28 + $0x4c8] sm:$0xff]  ;;  %1400 = vst [vmem:[%s2034_s20 + $0x498] sm:$0xff] %v1144_v23  ;;  %v893_v34 = vsub.f32 %v381_v27, %v637_v31  ;;  %v383_v36 = vld [vmem:[%s2005_s28 + $0x4d0] sm:$0xff]  ;;  %v384_v41 = vld [vmem:[%s2005_s28 + $0x4d8] sm:$0xff] }
  0xe8   : > { %v1147_v33 = vand.u32 2147483647, %v891_v24  ;;  %v638_v35 = vld [vmem:[%s2013_s24 + $0x4c8] sm:$0xff]  ;;  %v639_v37 = vld [vmem:[%s2013_s24 + $0x4d0] sm:$0xff]  ;;  %1401 = vst [vmem:[%s2034_s20 + $0x4a0] sm:$0xff] %v1145_v28  ;;  %v640_v42 = vld [vmem:[%s2013_s24 + $0x4d8] sm:$0xff] }
  0xe9   : > { %1402 = vst [vmem:[%s2034_s20 + $0x4a8] sm:$0xff] %v1146_v29  ;;  %v1148_v38 = vand.u32 2147483647, %v892_v30  ;;  %v894_v39 = vsub.f32 %v382_v32, %v638_v35  ;;  %v895_v40 = vsub.f32 %v383_v36, %v639_v37  ;;  %v385_v43 = vld [vmem:[%s2005_s28 + $0x4e0] sm:$0xff]  ;;  %v1149_v44 = vand.u32 2147483647, %v893_v34 }
  0xea   : > { %1403 = vst [vmem:[%s2034_s20 + $0x4b0] sm:$0xff] %v1147_v33  ;;  %v896_v45 = vsub.f32 %v384_v41, %v640_v42  ;;  %v641_v46 = vld [vmem:[%s2013_s24 + $0x4e0] sm:$0xff]  ;;  %v386_v47 = vld [vmem:[%s2005_s28 + $0x4e8] sm:$0xff]  ;;  %v387_v53 = vld [vmem:[%s2005_s28 + $0x4f0] sm:$0xff] }
  0xeb   : > { %v642_v48 = vld [vmem:[%s2013_s24 + $0x4e8] sm:$0xff]  ;;  %1404 = vst [vmem:[%s2034_s20 + $0x4b8] sm:$0xff] %v1148_v38  ;;  %v1150_v49 = vand.u32 2147483647, %v894_v39  ;;  %v1151_v50 = vand.u32 2147483647, %v895_v40  ;;  %v897_v51 = vsub.f32 %v385_v43, %v641_v46 }
  0xec   : > { %v898_v52 = vsub.f32 %v386_v47, %v642_v48  ;;  %v643_v54 = vld [vmem:[%s2013_s24 + $0x4f0] sm:$0xff]  ;;  %1405 = vst [vmem:[%s2034_s20 + $0x4c0] sm:$0xff] %v1149_v44  ;;  %v1152_v55 = vand.u32 2147483647, %v896_v45  ;;  %v388_v57 = vld [vmem:[%s2005_s28 + $0x4f8] sm:$0xff]  ;;  %v389_v59 = vld [vmem:[%s2005_s28 + $0x500] sm:$0xff] }
  0xed   : > { %v899_v56 = vsub.f32 %v387_v53, %v643_v54  ;;  %v644_v58 = vld [vmem:[%s2013_s24 + $0x4f8] sm:$0xff]  ;;  %1406 = vst [vmem:[%s2034_s20 + $0x4c8] sm:$0xff] %v1150_v49  ;;  %1407 = vst [vmem:[%s2034_s20 + $0x4d0] sm:$0xff] %v1151_v50  ;;  %v1153_v60 = vand.u32 2147483647, %v897_v51  ;;  %v645_v63 = vld [vmem:[%s2013_s24 + $0x500] sm:$0xff] }
  0xee   : > { %v1154_v61 = vand.u32 2147483647, %v898_v52  ;;  %v900_v62 = vsub.f32 %v388_v57, %v644_v58  ;;  %v390_v0 = vld [vmem:[%s2005_s28 + $0x508] sm:$0xff]  ;;  %1408 = vst [vmem:[%s2034_s20 + $0x4d8] sm:$0xff] %v1152_v55  ;;  %v901_v2 = vsub.f32 %v389_v59, %v645_v63  ;;  %v391_v4 = vld [vmem:[%s2005_s28 + $0x510] sm:$0xff]  ;;  %v392_v9 = vld [vmem:[%s2005_s28 + $0x518] sm:$0xff] }
  0xef   : > { %v1155_v1 = vand.u32 2147483647, %v899_v56  ;;  %v646_v3 = vld [vmem:[%s2013_s24 + $0x508] sm:$0xff]  ;;  %v647_v5 = vld [vmem:[%s2013_s24 + $0x510] sm:$0xff]  ;;  %1409 = vst [vmem:[%s2034_s20 + $0x4e0] sm:$0xff] %v1153_v60  ;;  %v648_v10 = vld [vmem:[%s2013_s24 + $0x518] sm:$0xff] }
  0xf0   : > { %1410 = vst [vmem:[%s2034_s20 + $0x4e8] sm:$0xff] %v1154_v61  ;;  %v1156_v6 = vand.u32 2147483647, %v900_v62  ;;  %v902_v7 = vsub.f32 %v390_v0, %v646_v3  ;;  %v903_v8 = vsub.f32 %v391_v4, %v647_v5  ;;  %v393_v11 = vld [vmem:[%s2005_s28 + $0x520] sm:$0xff]  ;;  %v1157_v12 = vand.u32 2147483647, %v901_v2 }
  0xf1   : > { %1411 = vst [vmem:[%s2034_s20 + $0x4f0] sm:$0xff] %v1155_v1  ;;  %v904_v13 = vsub.f32 %v392_v9, %v648_v10  ;;  %v649_v14 = vld [vmem:[%s2013_s24 + $0x520] sm:$0xff]  ;;  %v394_v15 = vld [vmem:[%s2005_s28 + $0x528] sm:$0xff]  ;;  %v395_v21 = vld [vmem:[%s2005_s28 + $0x530] sm:$0xff] }
  0xf2   : > { %v650_v16 = vld [vmem:[%s2013_s24 + $0x528] sm:$0xff]  ;;  %1412 = vst [vmem:[%s2034_s20 + $0x4f8] sm:$0xff] %v1156_v6  ;;  %v1158_v17 = vand.u32 2147483647, %v902_v7  ;;  %v1159_v18 = vand.u32 2147483647, %v903_v8  ;;  %v905_v19 = vsub.f32 %v393_v11, %v649_v14 }
  0xf3   : > { %v906_v20 = vsub.f32 %v394_v15, %v650_v16  ;;  %v651_v22 = vld [vmem:[%s2013_s24 + $0x530] sm:$0xff]  ;;  %1413 = vst [vmem:[%s2034_s20 + $0x500] sm:$0xff] %v1157_v12  ;;  %v1160_v23 = vand.u32 2147483647, %v904_v13  ;;  %v396_v25 = vld [vmem:[%s2005_s28 + $0x538] sm:$0xff]  ;;  %v397_v27 = vld [vmem:[%s2005_s28 + $0x540] sm:$0xff] }
  0xf4   : > { %v907_v24 = vsub.f32 %v395_v21, %v651_v22  ;;  %v652_v26 = vld [vmem:[%s2013_s24 + $0x538] sm:$0xff]  ;;  %1414 = vst [vmem:[%s2034_s20 + $0x508] sm:$0xff] %v1158_v17  ;;  %1415 = vst [vmem:[%s2034_s20 + $0x510] sm:$0xff] %v1159_v18  ;;  %v1161_v28 = vand.u32 2147483647, %v905_v19  ;;  %v653_v31 = vld [vmem:[%s2013_s24 + $0x540] sm:$0xff] }
  0xf5   : > { %v1162_v29 = vand.u32 2147483647, %v906_v20  ;;  %v908_v30 = vsub.f32 %v396_v25, %v652_v26  ;;  %v398_v32 = vld [vmem:[%s2005_s28 + $0x548] sm:$0xff]  ;;  %1416 = vst [vmem:[%s2034_s20 + $0x518] sm:$0xff] %v1160_v23  ;;  %v909_v34 = vsub.f32 %v397_v27, %v653_v31  ;;  %v399_v36 = vld [vmem:[%s2005_s28 + $0x550] sm:$0xff]  ;;  %v400_v41 = vld [vmem:[%s2005_s28 + $0x558] sm:$0xff] }
  0xf6   : > { %v1163_v33 = vand.u32 2147483647, %v907_v24  ;;  %v654_v35 = vld [vmem:[%s2013_s24 + $0x548] sm:$0xff]  ;;  %v655_v37 = vld [vmem:[%s2013_s24 + $0x550] sm:$0xff]  ;;  %1417 = vst [vmem:[%s2034_s20 + $0x520] sm:$0xff] %v1161_v28  ;;  %v656_v42 = vld [vmem:[%s2013_s24 + $0x558] sm:$0xff] }
  0xf7   : > { %1418 = vst [vmem:[%s2034_s20 + $0x528] sm:$0xff] %v1162_v29  ;;  %v1164_v38 = vand.u32 2147483647, %v908_v30  ;;  %v910_v39 = vsub.f32 %v398_v32, %v654_v35  ;;  %v911_v40 = vsub.f32 %v399_v36, %v655_v37  ;;  %v401_v43 = vld [vmem:[%s2005_s28 + $0x560] sm:$0xff]  ;;  %v1165_v44 = vand.u32 2147483647, %v909_v34 }
  0xf8   : > { %1419 = vst [vmem:[%s2034_s20 + $0x530] sm:$0xff] %v1163_v33  ;;  %v912_v45 = vsub.f32 %v400_v41, %v656_v42  ;;  %v657_v46 = vld [vmem:[%s2013_s24 + $0x560] sm:$0xff]  ;;  %v402_v47 = vld [vmem:[%s2005_s28 + $0x568] sm:$0xff]  ;;  %v403_v53 = vld [vmem:[%s2005_s28 + $0x570] sm:$0xff] }
  0xf9   : > { %v658_v48 = vld [vmem:[%s2013_s24 + $0x568] sm:$0xff]  ;;  %1420 = vst [vmem:[%s2034_s20 + $0x538] sm:$0xff] %v1164_v38  ;;  %v1166_v49 = vand.u32 2147483647, %v910_v39  ;;  %v1167_v50 = vand.u32 2147483647, %v911_v40  ;;  %v913_v51 = vsub.f32 %v401_v43, %v657_v46 }
  0xfa   : > { %v914_v52 = vsub.f32 %v402_v47, %v658_v48  ;;  %v659_v54 = vld [vmem:[%s2013_s24 + $0x570] sm:$0xff]  ;;  %1421 = vst [vmem:[%s2034_s20 + $0x540] sm:$0xff] %v1165_v44  ;;  %v1168_v55 = vand.u32 2147483647, %v912_v45  ;;  %v404_v57 = vld [vmem:[%s2005_s28 + $0x578] sm:$0xff]  ;;  %v405_v59 = vld [vmem:[%s2005_s28 + $0x580] sm:$0xff] }
  0xfb   : > { %v915_v56 = vsub.f32 %v403_v53, %v659_v54  ;;  %v660_v58 = vld [vmem:[%s2013_s24 + $0x578] sm:$0xff]  ;;  %1422 = vst [vmem:[%s2034_s20 + $0x548] sm:$0xff] %v1166_v49  ;;  %1423 = vst [vmem:[%s2034_s20 + $0x550] sm:$0xff] %v1167_v50  ;;  %v1169_v60 = vand.u32 2147483647, %v913_v51  ;;  %v661_v63 = vld [vmem:[%s2013_s24 + $0x580] sm:$0xff] }
  0xfc   : > { %v1170_v61 = vand.u32 2147483647, %v914_v52  ;;  %v916_v62 = vsub.f32 %v404_v57, %v660_v58  ;;  %v406_v0 = vld [vmem:[%s2005_s28 + $0x588] sm:$0xff]  ;;  %1424 = vst [vmem:[%s2034_s20 + $0x558] sm:$0xff] %v1168_v55  ;;  %v917_v2 = vsub.f32 %v405_v59, %v661_v63  ;;  %v407_v4 = vld [vmem:[%s2005_s28 + $0x590] sm:$0xff]  ;;  %v408_v9 = vld [vmem:[%s2005_s28 + $0x598] sm:$0xff] }
  0xfd   : > { %v1171_v1 = vand.u32 2147483647, %v915_v56  ;;  %v662_v3 = vld [vmem:[%s2013_s24 + $0x588] sm:$0xff]  ;;  %v663_v5 = vld [vmem:[%s2013_s24 + $0x590] sm:$0xff]  ;;  %1425 = vst [vmem:[%s2034_s20 + $0x560] sm:$0xff] %v1169_v60  ;;  %v664_v10 = vld [vmem:[%s2013_s24 + $0x598] sm:$0xff] }
  0xfe   : > { %1426 = vst [vmem:[%s2034_s20 + $0x568] sm:$0xff] %v1170_v61  ;;  %v1172_v6 = vand.u32 2147483647, %v916_v62  ;;  %v918_v7 = vsub.f32 %v406_v0, %v662_v3  ;;  %v919_v8 = vsub.f32 %v407_v4, %v663_v5  ;;  %v409_v11 = vld [vmem:[%s2005_s28 + $0x5a0] sm:$0xff]  ;;  %v1173_v12 = vand.u32 2147483647, %v917_v2 }
  0xff   : > { %1427 = vst [vmem:[%s2034_s20 + $0x570] sm:$0xff] %v1171_v1  ;;  %v920_v13 = vsub.f32 %v408_v9, %v664_v10  ;;  %v665_v14 = vld [vmem:[%s2013_s24 + $0x5a0] sm:$0xff]  ;;  %v410_v15 = vld [vmem:[%s2005_s28 + $0x5a8] sm:$0xff]  ;;  %v411_v21 = vld [vmem:[%s2005_s28 + $0x5b0] sm:$0xff] }
 0x100   : > { %v666_v16 = vld [vmem:[%s2013_s24 + $0x5a8] sm:$0xff]  ;;  %1428 = vst [vmem:[%s2034_s20 + $0x578] sm:$0xff] %v1172_v6  ;;  %v1174_v17 = vand.u32 2147483647, %v918_v7  ;;  %v1175_v18 = vand.u32 2147483647, %v919_v8  ;;  %v921_v19 = vsub.f32 %v409_v11, %v665_v14 }
 0x101   : > { %v922_v20 = vsub.f32 %v410_v15, %v666_v16  ;;  %v667_v22 = vld [vmem:[%s2013_s24 + $0x5b0] sm:$0xff]  ;;  %1429 = vst [vmem:[%s2034_s20 + $0x580] sm:$0xff] %v1173_v12  ;;  %v1176_v23 = vand.u32 2147483647, %v920_v13  ;;  %v412_v25 = vld [vmem:[%s2005_s28 + $0x5b8] sm:$0xff]  ;;  %v413_v27 = vld [vmem:[%s2005_s28 + $0x5c0] sm:$0xff] }
 0x102   : > { %v923_v24 = vsub.f32 %v411_v21, %v667_v22  ;;  %v668_v26 = vld [vmem:[%s2013_s24 + $0x5b8] sm:$0xff]  ;;  %1430 = vst [vmem:[%s2034_s20 + $0x588] sm:$0xff] %v1174_v17  ;;  %1431 = vst [vmem:[%s2034_s20 + $0x590] sm:$0xff] %v1175_v18  ;;  %v1177_v28 = vand.u32 2147483647, %v921_v19  ;;  %v669_v31 = vld [vmem:[%s2013_s24 + $0x5c0] sm:$0xff] }
 0x103   : > { %v1178_v29 = vand.u32 2147483647, %v922_v20  ;;  %v924_v30 = vsub.f32 %v412_v25, %v668_v26  ;;  %v414_v32 = vld [vmem:[%s2005_s28 + $0x5c8] sm:$0xff]  ;;  %1432 = vst [vmem:[%s2034_s20 + $0x598] sm:$0xff] %v1176_v23  ;;  %v925_v34 = vsub.f32 %v413_v27, %v669_v31  ;;  %v415_v36 = vld [vmem:[%s2005_s28 + $0x5d0] sm:$0xff]  ;;  %v416_v41 = vld [vmem:[%s2005_s28 + $0x5d8] sm:$0xff] }
 0x104   : > { %v1179_v33 = vand.u32 2147483647, %v923_v24  ;;  %v670_v35 = vld [vmem:[%s2013_s24 + $0x5c8] sm:$0xff]  ;;  %v671_v37 = vld [vmem:[%s2013_s24 + $0x5d0] sm:$0xff]  ;;  %1433 = vst [vmem:[%s2034_s20 + $0x5a0] sm:$0xff] %v1177_v28  ;;  %v672_v42 = vld [vmem:[%s2013_s24 + $0x5d8] sm:$0xff] }
 0x105   : > { %1434 = vst [vmem:[%s2034_s20 + $0x5a8] sm:$0xff] %v1178_v29  ;;  %v1180_v38 = vand.u32 2147483647, %v924_v30  ;;  %v926_v39 = vsub.f32 %v414_v32, %v670_v35  ;;  %v927_v40 = vsub.f32 %v415_v36, %v671_v37  ;;  %v417_v43 = vld [vmem:[%s2005_s28 + $0x5e0] sm:$0xff]  ;;  %v1181_v44 = vand.u32 2147483647, %v925_v34 }
 0x106   : > { %1435 = vst [vmem:[%s2034_s20 + $0x5b0] sm:$0xff] %v1179_v33  ;;  %v928_v45 = vsub.f32 %v416_v41, %v672_v42  ;;  %v673_v46 = vld [vmem:[%s2013_s24 + $0x5e0] sm:$0xff]  ;;  %v418_v47 = vld [vmem:[%s2005_s28 + $0x5e8] sm:$0xff]  ;;  %v419_v53 = vld [vmem:[%s2005_s28 + $0x5f0] sm:$0xff] }
 0x107   : > { %v674_v48 = vld [vmem:[%s2013_s24 + $0x5e8] sm:$0xff]  ;;  %1436 = vst [vmem:[%s2034_s20 + $0x5b8] sm:$0xff] %v1180_v38  ;;  %v1182_v49 = vand.u32 2147483647, %v926_v39  ;;  %v1183_v50 = vand.u32 2147483647, %v927_v40  ;;  %v929_v51 = vsub.f32 %v417_v43, %v673_v46 }
 0x108   : > { %v930_v52 = vsub.f32 %v418_v47, %v674_v48  ;;  %v675_v54 = vld [vmem:[%s2013_s24 + $0x5f0] sm:$0xff]  ;;  %1437 = vst [vmem:[%s2034_s20 + $0x5c0] sm:$0xff] %v1181_v44  ;;  %v1184_v55 = vand.u32 2147483647, %v928_v45  ;;  %v420_v57 = vld [vmem:[%s2005_s28 + $0x5f8] sm:$0xff]  ;;  %v421_v59 = vld [vmem:[%s2005_s28 + $0x600] sm:$0xff] }
 0x109   : > { %v931_v56 = vsub.f32 %v419_v53, %v675_v54  ;;  %v676_v58 = vld [vmem:[%s2013_s24 + $0x5f8] sm:$0xff]  ;;  %1438 = vst [vmem:[%s2034_s20 + $0x5c8] sm:$0xff] %v1182_v49  ;;  %1439 = vst [vmem:[%s2034_s20 + $0x5d0] sm:$0xff] %v1183_v50  ;;  %v1185_v60 = vand.u32 2147483647, %v929_v51  ;;  %v677_v63 = vld [vmem:[%s2013_s24 + $0x600] sm:$0xff] }
 0x10a   : > { %v1186_v61 = vand.u32 2147483647, %v930_v52  ;;  %v932_v62 = vsub.f32 %v420_v57, %v676_v58  ;;  %v422_v0 = vld [vmem:[%s2005_s28 + $0x608] sm:$0xff]  ;;  %1440 = vst [vmem:[%s2034_s20 + $0x5d8] sm:$0xff] %v1184_v55  ;;  %v933_v2 = vsub.f32 %v421_v59, %v677_v63  ;;  %v423_v4 = vld [vmem:[%s2005_s28 + $0x610] sm:$0xff]  ;;  %v424_v9 = vld [vmem:[%s2005_s28 + $0x618] sm:$0xff] }
 0x10b   : > { %v1187_v1 = vand.u32 2147483647, %v931_v56  ;;  %v678_v3 = vld [vmem:[%s2013_s24 + $0x608] sm:$0xff]  ;;  %v679_v5 = vld [vmem:[%s2013_s24 + $0x610] sm:$0xff]  ;;  %1441 = vst [vmem:[%s2034_s20 + $0x5e0] sm:$0xff] %v1185_v60  ;;  %v680_v10 = vld [vmem:[%s2013_s24 + $0x618] sm:$0xff] }
 0x10c   : > { %1442 = vst [vmem:[%s2034_s20 + $0x5e8] sm:$0xff] %v1186_v61  ;;  %v1188_v6 = vand.u32 2147483647, %v932_v62  ;;  %v934_v7 = vsub.f32 %v422_v0, %v678_v3  ;;  %v935_v8 = vsub.f32 %v423_v4, %v679_v5  ;;  %v425_v11 = vld [vmem:[%s2005_s28 + $0x620] sm:$0xff]  ;;  %v1189_v12 = vand.u32 2147483647, %v933_v2 }
 0x10d   : > { %1443 = vst [vmem:[%s2034_s20 + $0x5f0] sm:$0xff] %v1187_v1  ;;  %v936_v13 = vsub.f32 %v424_v9, %v680_v10  ;;  %v681_v14 = vld [vmem:[%s2013_s24 + $0x620] sm:$0xff]  ;;  %v426_v15 = vld [vmem:[%s2005_s28 + $0x628] sm:$0xff]  ;;  %v427_v21 = vld [vmem:[%s2005_s28 + $0x630] sm:$0xff] }
 0x10e   : > { %v682_v16 = vld [vmem:[%s2013_s24 + $0x628] sm:$0xff]  ;;  %1444 = vst [vmem:[%s2034_s20 + $0x5f8] sm:$0xff] %v1188_v6  ;;  %v1190_v17 = vand.u32 2147483647, %v934_v7  ;;  %v1191_v18 = vand.u32 2147483647, %v935_v8  ;;  %v937_v19 = vsub.f32 %v425_v11, %v681_v14 }
 0x10f   : > { %v938_v20 = vsub.f32 %v426_v15, %v682_v16  ;;  %v683_v22 = vld [vmem:[%s2013_s24 + $0x630] sm:$0xff]  ;;  %1445 = vst [vmem:[%s2034_s20 + $0x600] sm:$0xff] %v1189_v12  ;;  %v1192_v23 = vand.u32 2147483647, %v936_v13  ;;  %v428_v25 = vld [vmem:[%s2005_s28 + $0x638] sm:$0xff]  ;;  %v429_v27 = vld [vmem:[%s2005_s28 + $0x640] sm:$0xff] }
 0x110   : > { %v939_v24 = vsub.f32 %v427_v21, %v683_v22  ;;  %v684_v26 = vld [vmem:[%s2013_s24 + $0x638] sm:$0xff]  ;;  %1446 = vst [vmem:[%s2034_s20 + $0x608] sm:$0xff] %v1190_v17  ;;  %1447 = vst [vmem:[%s2034_s20 + $0x610] sm:$0xff] %v1191_v18  ;;  %v1193_v28 = vand.u32 2147483647, %v937_v19  ;;  %v685_v31 = vld [vmem:[%s2013_s24 + $0x640] sm:$0xff] }
 0x111   : > { %v1194_v29 = vand.u32 2147483647, %v938_v20  ;;  %v940_v30 = vsub.f32 %v428_v25, %v684_v26  ;;  %v430_v32 = vld [vmem:[%s2005_s28 + $0x648] sm:$0xff]  ;;  %1448 = vst [vmem:[%s2034_s20 + $0x618] sm:$0xff] %v1192_v23  ;;  %v941_v34 = vsub.f32 %v429_v27, %v685_v31  ;;  %v431_v36 = vld [vmem:[%s2005_s28 + $0x650] sm:$0xff]  ;;  %v432_v41 = vld [vmem:[%s2005_s28 + $0x658] sm:$0xff] }
 0x112   : > { %v1195_v33 = vand.u32 2147483647, %v939_v24  ;;  %v686_v35 = vld [vmem:[%s2013_s24 + $0x648] sm:$0xff]  ;;  %v687_v37 = vld [vmem:[%s2013_s24 + $0x650] sm:$0xff]  ;;  %1449 = vst [vmem:[%s2034_s20 + $0x620] sm:$0xff] %v1193_v28  ;;  %v688_v42 = vld [vmem:[%s2013_s24 + $0x658] sm:$0xff] }
 0x113   : > { %1450 = vst [vmem:[%s2034_s20 + $0x628] sm:$0xff] %v1194_v29  ;;  %v1196_v38 = vand.u32 2147483647, %v940_v30  ;;  %v942_v39 = vsub.f32 %v430_v32, %v686_v35  ;;  %v943_v40 = vsub.f32 %v431_v36, %v687_v37  ;;  %v433_v43 = vld [vmem:[%s2005_s28 + $0x660] sm:$0xff]  ;;  %v1197_v44 = vand.u32 2147483647, %v941_v34 }
 0x114   : > { %1451 = vst [vmem:[%s2034_s20 + $0x630] sm:$0xff] %v1195_v33  ;;  %v944_v45 = vsub.f32 %v432_v41, %v688_v42  ;;  %v689_v46 = vld [vmem:[%s2013_s24 + $0x660] sm:$0xff]  ;;  %v434_v47 = vld [vmem:[%s2005_s28 + $0x668] sm:$0xff]  ;;  %v435_v53 = vld [vmem:[%s2005_s28 + $0x670] sm:$0xff] }
 0x115   : > { %v690_v48 = vld [vmem:[%s2013_s24 + $0x668] sm:$0xff]  ;;  %1452 = vst [vmem:[%s2034_s20 + $0x638] sm:$0xff] %v1196_v38  ;;  %v1198_v49 = vand.u32 2147483647, %v942_v39  ;;  %v1199_v50 = vand.u32 2147483647, %v943_v40  ;;  %v945_v51 = vsub.f32 %v433_v43, %v689_v46 }
 0x116   : > { %v946_v52 = vsub.f32 %v434_v47, %v690_v48  ;;  %v691_v54 = vld [vmem:[%s2013_s24 + $0x670] sm:$0xff]  ;;  %1453 = vst [vmem:[%s2034_s20 + $0x640] sm:$0xff] %v1197_v44  ;;  %v1200_v55 = vand.u32 2147483647, %v944_v45  ;;  %v436_v57 = vld [vmem:[%s2005_s28 + $0x678] sm:$0xff]  ;;  %v437_v59 = vld [vmem:[%s2005_s28 + $0x680] sm:$0xff] }
 0x117   : > { %v947_v56 = vsub.f32 %v435_v53, %v691_v54  ;;  %v692_v58 = vld [vmem:[%s2013_s24 + $0x678] sm:$0xff]  ;;  %1454 = vst [vmem:[%s2034_s20 + $0x648] sm:$0xff] %v1198_v49  ;;  %1455 = vst [vmem:[%s2034_s20 + $0x650] sm:$0xff] %v1199_v50  ;;  %v1201_v60 = vand.u32 2147483647, %v945_v51  ;;  %v693_v63 = vld [vmem:[%s2013_s24 + $0x680] sm:$0xff] }
 0x118   : > { %v1202_v61 = vand.u32 2147483647, %v946_v52  ;;  %v948_v62 = vsub.f32 %v436_v57, %v692_v58  ;;  %v438_v0 = vld [vmem:[%s2005_s28 + $0x688] sm:$0xff]  ;;  %1456 = vst [vmem:[%s2034_s20 + $0x658] sm:$0xff] %v1200_v55  ;;  %v949_v2 = vsub.f32 %v437_v59, %v693_v63  ;;  %v439_v4 = vld [vmem:[%s2005_s28 + $0x690] sm:$0xff]  ;;  %v440_v9 = vld [vmem:[%s2005_s28 + $0x698] sm:$0xff] }
 0x119   : > { %v1203_v1 = vand.u32 2147483647, %v947_v56  ;;  %v694_v3 = vld [vmem:[%s2013_s24 + $0x688] sm:$0xff]  ;;  %v695_v5 = vld [vmem:[%s2013_s24 + $0x690] sm:$0xff]  ;;  %1457 = vst [vmem:[%s2034_s20 + $0x660] sm:$0xff] %v1201_v60  ;;  %v696_v10 = vld [vmem:[%s2013_s24 + $0x698] sm:$0xff] }
 0x11a   : > { %1458 = vst [vmem:[%s2034_s20 + $0x668] sm:$0xff] %v1202_v61  ;;  %v1204_v6 = vand.u32 2147483647, %v948_v62  ;;  %v950_v7 = vsub.f32 %v438_v0, %v694_v3  ;;  %v951_v8 = vsub.f32 %v439_v4, %v695_v5  ;;  %v441_v11 = vld [vmem:[%s2005_s28 + $0x6a0] sm:$0xff]  ;;  %v1205_v12 = vand.u32 2147483647, %v949_v2 }
 0x11b   : > { %1459 = vst [vmem:[%s2034_s20 + $0x670] sm:$0xff] %v1203_v1  ;;  %v952_v13 = vsub.f32 %v440_v9, %v696_v10  ;;  %v697_v14 = vld [vmem:[%s2013_s24 + $0x6a0] sm:$0xff]  ;;  %v442_v15 = vld [vmem:[%s2005_s28 + $0x6a8] sm:$0xff]  ;;  %v443_v21 = vld [vmem:[%s2005_s28 + $0x6b0] sm:$0xff] }
 0x11c   : > { %v698_v16 = vld [vmem:[%s2013_s24 + $0x6a8] sm:$0xff]  ;;  %1460 = vst [vmem:[%s2034_s20 + $0x678] sm:$0xff] %v1204_v6  ;;  %v1206_v17 = vand.u32 2147483647, %v950_v7  ;;  %v1207_v18 = vand.u32 2147483647, %v951_v8  ;;  %v953_v19 = vsub.f32 %v441_v11, %v697_v14 }
 0x11d   : > { %v954_v20 = vsub.f32 %v442_v15, %v698_v16  ;;  %v699_v22 = vld [vmem:[%s2013_s24 + $0x6b0] sm:$0xff]  ;;  %1461 = vst [vmem:[%s2034_s20 + $0x680] sm:$0xff] %v1205_v12  ;;  %v1208_v23 = vand.u32 2147483647, %v952_v13  ;;  %v444_v25 = vld [vmem:[%s2005_s28 + $0x6b8] sm:$0xff]  ;;  %v445_v27 = vld [vmem:[%s2005_s28 + $0x6c0] sm:$0xff] }
 0x11e   : > { %v955_v24 = vsub.f32 %v443_v21, %v699_v22  ;;  %v700_v26 = vld [vmem:[%s2013_s24 + $0x6b8] sm:$0xff]  ;;  %1462 = vst [vmem:[%s2034_s20 + $0x688] sm:$0xff] %v1206_v17  ;;  %1463 = vst [vmem:[%s2034_s20 + $0x690] sm:$0xff] %v1207_v18  ;;  %v1209_v28 = vand.u32 2147483647, %v953_v19  ;;  %v701_v31 = vld [vmem:[%s2013_s24 + $0x6c0] sm:$0xff] }
 0x11f   : > { %v1210_v29 = vand.u32 2147483647, %v954_v20  ;;  %v956_v30 = vsub.f32 %v444_v25, %v700_v26  ;;  %v446_v32 = vld [vmem:[%s2005_s28 + $0x6c8] sm:$0xff]  ;;  %1464 = vst [vmem:[%s2034_s20 + $0x698] sm:$0xff] %v1208_v23  ;;  %v957_v34 = vsub.f32 %v445_v27, %v701_v31  ;;  %v447_v36 = vld [vmem:[%s2005_s28 + $0x6d0] sm:$0xff]  ;;  %v448_v41 = vld [vmem:[%s2005_s28 + $0x6d8] sm:$0xff] }
 0x120   : > { %v1211_v33 = vand.u32 2147483647, %v955_v24  ;;  %v702_v35 = vld [vmem:[%s2013_s24 + $0x6c8] sm:$0xff]  ;;  %v703_v37 = vld [vmem:[%s2013_s24 + $0x6d0] sm:$0xff]  ;;  %1465 = vst [vmem:[%s2034_s20 + $0x6a0] sm:$0xff] %v1209_v28  ;;  %v704_v42 = vld [vmem:[%s2013_s24 + $0x6d8] sm:$0xff] }
 0x121   : > { %1466 = vst [vmem:[%s2034_s20 + $0x6a8] sm:$0xff] %v1210_v29  ;;  %v1212_v38 = vand.u32 2147483647, %v956_v30  ;;  %v958_v39 = vsub.f32 %v446_v32, %v702_v35  ;;  %v959_v40 = vsub.f32 %v447_v36, %v703_v37  ;;  %v449_v43 = vld [vmem:[%s2005_s28 + $0x6e0] sm:$0xff]  ;;  %v1213_v44 = vand.u32 2147483647, %v957_v34 }
 0x122   : > { %1467 = vst [vmem:[%s2034_s20 + $0x6b0] sm:$0xff] %v1211_v33  ;;  %v960_v45 = vsub.f32 %v448_v41, %v704_v42  ;;  %v705_v46 = vld [vmem:[%s2013_s24 + $0x6e0] sm:$0xff]  ;;  %v450_v47 = vld [vmem:[%s2005_s28 + $0x6e8] sm:$0xff]  ;;  %v451_v53 = vld [vmem:[%s2005_s28 + $0x6f0] sm:$0xff] }
 0x123   : > { %v706_v48 = vld [vmem:[%s2013_s24 + $0x6e8] sm:$0xff]  ;;  %1468 = vst [vmem:[%s2034_s20 + $0x6b8] sm:$0xff] %v1212_v38  ;;  %v1214_v49 = vand.u32 2147483647, %v958_v39  ;;  %v1215_v50 = vand.u32 2147483647, %v959_v40  ;;  %v961_v51 = vsub.f32 %v449_v43, %v705_v46 }
 0x124   : > { %v962_v52 = vsub.f32 %v450_v47, %v706_v48  ;;  %v707_v54 = vld [vmem:[%s2013_s24 + $0x6f0] sm:$0xff]  ;;  %1469 = vst [vmem:[%s2034_s20 + $0x6c0] sm:$0xff] %v1213_v44  ;;  %v1216_v55 = vand.u32 2147483647, %v960_v45  ;;  %v452_v57 = vld [vmem:[%s2005_s28 + $0x6f8] sm:$0xff]  ;;  %v453_v59 = vld [vmem:[%s2005_s28 + $0x700] sm:$0xff] }
 0x125   : > { %v963_v56 = vsub.f32 %v451_v53, %v707_v54  ;;  %v708_v58 = vld [vmem:[%s2013_s24 + $0x6f8] sm:$0xff]  ;;  %1470 = vst [vmem:[%s2034_s20 + $0x6c8] sm:$0xff] %v1214_v49  ;;  %1471 = vst [vmem:[%s2034_s20 + $0x6d0] sm:$0xff] %v1215_v50  ;;  %v1217_v60 = vand.u32 2147483647, %v961_v51  ;;  %v709_v63 = vld [vmem:[%s2013_s24 + $0x700] sm:$0xff] }
 0x126   : > { %v1218_v61 = vand.u32 2147483647, %v962_v52  ;;  %v964_v62 = vsub.f32 %v452_v57, %v708_v58  ;;  %v454_v0 = vld [vmem:[%s2005_s28 + $0x708] sm:$0xff]  ;;  %1472 = vst [vmem:[%s2034_s20 + $0x6d8] sm:$0xff] %v1216_v55  ;;  %v965_v2 = vsub.f32 %v453_v59, %v709_v63  ;;  %v455_v4 = vld [vmem:[%s2005_s28 + $0x710] sm:$0xff]  ;;  %v456_v9 = vld [vmem:[%s2005_s28 + $0x718] sm:$0xff] }
 0x127   : > { %v1219_v1 = vand.u32 2147483647, %v963_v56  ;;  %v710_v3 = vld [vmem:[%s2013_s24 + $0x708] sm:$0xff]  ;;  %v711_v5 = vld [vmem:[%s2013_s24 + $0x710] sm:$0xff]  ;;  %1473 = vst [vmem:[%s2034_s20 + $0x6e0] sm:$0xff] %v1217_v60  ;;  %v712_v10 = vld [vmem:[%s2013_s24 + $0x718] sm:$0xff] }
 0x128   : > { %1474 = vst [vmem:[%s2034_s20 + $0x6e8] sm:$0xff] %v1218_v61  ;;  %v1220_v6 = vand.u32 2147483647, %v964_v62  ;;  %v966_v7 = vsub.f32 %v454_v0, %v710_v3  ;;  %v967_v8 = vsub.f32 %v455_v4, %v711_v5  ;;  %v457_v11 = vld [vmem:[%s2005_s28 + $0x720] sm:$0xff]  ;;  %v1221_v12 = vand.u32 2147483647, %v965_v2 }
 0x129   : > { %1475 = vst [vmem:[%s2034_s20 + $0x6f0] sm:$0xff] %v1219_v1  ;;  %v968_v13 = vsub.f32 %v456_v9, %v712_v10  ;;  %v713_v14 = vld [vmem:[%s2013_s24 + $0x720] sm:$0xff]  ;;  %v458_v15 = vld [vmem:[%s2005_s28 + $0x728] sm:$0xff]  ;;  %v459_v21 = vld [vmem:[%s2005_s28 + $0x730] sm:$0xff] }
 0x12a   : > { %v714_v16 = vld [vmem:[%s2013_s24 + $0x728] sm:$0xff]  ;;  %1476 = vst [vmem:[%s2034_s20 + $0x6f8] sm:$0xff] %v1220_v6  ;;  %v1222_v17 = vand.u32 2147483647, %v966_v7  ;;  %v1223_v18 = vand.u32 2147483647, %v967_v8  ;;  %v969_v19 = vsub.f32 %v457_v11, %v713_v14 }
 0x12b   : > { %v970_v20 = vsub.f32 %v458_v15, %v714_v16  ;;  %v715_v22 = vld [vmem:[%s2013_s24 + $0x730] sm:$0xff]  ;;  %1477 = vst [vmem:[%s2034_s20 + $0x700] sm:$0xff] %v1221_v12  ;;  %v1224_v23 = vand.u32 2147483647, %v968_v13  ;;  %v460_v25 = vld [vmem:[%s2005_s28 + $0x738] sm:$0xff]  ;;  %v461_v27 = vld [vmem:[%s2005_s28 + $0x740] sm:$0xff] }
 0x12c   : > { %v971_v24 = vsub.f32 %v459_v21, %v715_v22  ;;  %v716_v26 = vld [vmem:[%s2013_s24 + $0x738] sm:$0xff]  ;;  %1478 = vst [vmem:[%s2034_s20 + $0x708] sm:$0xff] %v1222_v17  ;;  %1479 = vst [vmem:[%s2034_s20 + $0x710] sm:$0xff] %v1223_v18  ;;  %v1225_v28 = vand.u32 2147483647, %v969_v19  ;;  %v717_v31 = vld [vmem:[%s2013_s24 + $0x740] sm:$0xff] }
 0x12d   : > { %v1226_v29 = vand.u32 2147483647, %v970_v20  ;;  %v972_v30 = vsub.f32 %v460_v25, %v716_v26  ;;  %v462_v32 = vld [vmem:[%s2005_s28 + $0x748] sm:$0xff]  ;;  %1480 = vst [vmem:[%s2034_s20 + $0x718] sm:$0xff] %v1224_v23  ;;  %v973_v34 = vsub.f32 %v461_v27, %v717_v31  ;;  %v463_v36 = vld [vmem:[%s2005_s28 + $0x750] sm:$0xff]  ;;  %v464_v41 = vld [vmem:[%s2005_s28 + $0x758] sm:$0xff] }
 0x12e   : > { %v1227_v33 = vand.u32 2147483647, %v971_v24  ;;  %v718_v35 = vld [vmem:[%s2013_s24 + $0x748] sm:$0xff]  ;;  %v719_v37 = vld [vmem:[%s2013_s24 + $0x750] sm:$0xff]  ;;  %1481 = vst [vmem:[%s2034_s20 + $0x720] sm:$0xff] %v1225_v28  ;;  %v720_v42 = vld [vmem:[%s2013_s24 + $0x758] sm:$0xff] }
 0x12f   : > { %1482 = vst [vmem:[%s2034_s20 + $0x728] sm:$0xff] %v1226_v29  ;;  %v1228_v38 = vand.u32 2147483647, %v972_v30  ;;  %v974_v39 = vsub.f32 %v462_v32, %v718_v35  ;;  %v975_v40 = vsub.f32 %v463_v36, %v719_v37  ;;  %v465_v43 = vld [vmem:[%s2005_s28 + $0x760] sm:$0xff]  ;;  %v1229_v44 = vand.u32 2147483647, %v973_v34 }
 0x130   : > { %1483 = vst [vmem:[%s2034_s20 + $0x730] sm:$0xff] %v1227_v33  ;;  %v976_v45 = vsub.f32 %v464_v41, %v720_v42  ;;  %v721_v46 = vld [vmem:[%s2013_s24 + $0x760] sm:$0xff]  ;;  %v466_v47 = vld [vmem:[%s2005_s28 + $0x768] sm:$0xff]  ;;  %v467_v53 = vld [vmem:[%s2005_s28 + $0x770] sm:$0xff] }
 0x131   : > { %v722_v48 = vld [vmem:[%s2013_s24 + $0x768] sm:$0xff]  ;;  %1484 = vst [vmem:[%s2034_s20 + $0x738] sm:$0xff] %v1228_v38  ;;  %v1230_v49 = vand.u32 2147483647, %v974_v39  ;;  %v1231_v50 = vand.u32 2147483647, %v975_v40  ;;  %v977_v51 = vsub.f32 %v465_v43, %v721_v46 }
 0x132   : > { %v978_v52 = vsub.f32 %v466_v47, %v722_v48  ;;  %v723_v54 = vld [vmem:[%s2013_s24 + $0x770] sm:$0xff]  ;;  %1485 = vst [vmem:[%s2034_s20 + $0x740] sm:$0xff] %v1229_v44  ;;  %v1232_v55 = vand.u32 2147483647, %v976_v45  ;;  %v468_v57 = vld [vmem:[%s2005_s28 + $0x778] sm:$0xff]  ;;  %v469_v59 = vld [vmem:[%s2005_s28 + $0x780] sm:$0xff] }
 0x133   : > { %v979_v56 = vsub.f32 %v467_v53, %v723_v54  ;;  %v724_v58 = vld [vmem:[%s2013_s24 + $0x778] sm:$0xff]  ;;  %1486 = vst [vmem:[%s2034_s20 + $0x748] sm:$0xff] %v1230_v49  ;;  %1487 = vst [vmem:[%s2034_s20 + $0x750] sm:$0xff] %v1231_v50  ;;  %v1233_v60 = vand.u32 2147483647, %v977_v51  ;;  %v725_v63 = vld [vmem:[%s2013_s24 + $0x780] sm:$0xff] }
 0x134   : > { %v1234_v61 = vand.u32 2147483647, %v978_v52  ;;  %v980_v62 = vsub.f32 %v468_v57, %v724_v58  ;;  %v470_v0 = vld [vmem:[%s2005_s28 + $0x788] sm:$0xff]  ;;  %1488 = vst [vmem:[%s2034_s20 + $0x758] sm:$0xff] %v1232_v55  ;;  %v981_v2 = vsub.f32 %v469_v59, %v725_v63  ;;  %v471_v4 = vld [vmem:[%s2005_s28 + $0x790] sm:$0xff]  ;;  %v472_v9 = vld [vmem:[%s2005_s28 + $0x798] sm:$0xff] }
 0x135   : > { %v1235_v1 = vand.u32 2147483647, %v979_v56  ;;  %v726_v3 = vld [vmem:[%s2013_s24 + $0x788] sm:$0xff]  ;;  %v727_v5 = vld [vmem:[%s2013_s24 + $0x790] sm:$0xff]  ;;  %1489 = vst [vmem:[%s2034_s20 + $0x760] sm:$0xff] %v1233_v60  ;;  %v728_v10 = vld [vmem:[%s2013_s24 + $0x798] sm:$0xff] }
 0x136   : > { %1490 = vst [vmem:[%s2034_s20 + $0x768] sm:$0xff] %v1234_v61  ;;  %v1236_v6 = vand.u32 2147483647, %v980_v62  ;;  %v982_v7 = vsub.f32 %v470_v0, %v726_v3  ;;  %v983_v8 = vsub.f32 %v471_v4, %v727_v5  ;;  %v473_v11 = vld [vmem:[%s2005_s28 + $0x7a0] sm:$0xff]  ;;  %v1237_v12 = vand.u32 2147483647, %v981_v2 }
 0x137   : > { %1491 = vst [vmem:[%s2034_s20 + $0x770] sm:$0xff] %v1235_v1  ;;  %v984_v13 = vsub.f32 %v472_v9, %v728_v10  ;;  %v729_v14 = vld [vmem:[%s2013_s24 + $0x7a0] sm:$0xff]  ;;  %v474_v15 = vld [vmem:[%s2005_s28 + $0x7a8] sm:$0xff]  ;;  %v475_v21 = vld [vmem:[%s2005_s28 + $0x7b0] sm:$0xff] }
 0x138   : > { %v730_v16 = vld [vmem:[%s2013_s24 + $0x7a8] sm:$0xff]  ;;  %1492 = vst [vmem:[%s2034_s20 + $0x778] sm:$0xff] %v1236_v6  ;;  %v1238_v17 = vand.u32 2147483647, %v982_v7  ;;  %v1239_v18 = vand.u32 2147483647, %v983_v8  ;;  %v985_v19 = vsub.f32 %v473_v11, %v729_v14 }
 0x139   : > { %v986_v20 = vsub.f32 %v474_v15, %v730_v16  ;;  %v731_v22 = vld [vmem:[%s2013_s24 + $0x7b0] sm:$0xff]  ;;  %1493 = vst [vmem:[%s2034_s20 + $0x780] sm:$0xff] %v1237_v12  ;;  %v1240_v23 = vand.u32 2147483647, %v984_v13  ;;  %v476_v25 = vld [vmem:[%s2005_s28 + $0x7b8] sm:$0xff]  ;;  %v477_v27 = vld [vmem:[%s2005_s28 + $0x7c0] sm:$0xff] }
 0x13a   : > { %v987_v24 = vsub.f32 %v475_v21, %v731_v22  ;;  %v732_v26 = vld [vmem:[%s2013_s24 + $0x7b8] sm:$0xff]  ;;  %1494 = vst [vmem:[%s2034_s20 + $0x788] sm:$0xff] %v1238_v17  ;;  %1495 = vst [vmem:[%s2034_s20 + $0x790] sm:$0xff] %v1239_v18  ;;  %v1241_v28 = vand.u32 2147483647, %v985_v19  ;;  %v733_v31 = vld [vmem:[%s2013_s24 + $0x7c0] sm:$0xff] }
 0x13b   : > { %v1242_v29 = vand.u32 2147483647, %v986_v20  ;;  %v988_v30 = vsub.f32 %v476_v25, %v732_v26  ;;  %v478_v32 = vld [vmem:[%s2005_s28 + $0x7c8] sm:$0xff]  ;;  %1496 = vst [vmem:[%s2034_s20 + $0x798] sm:$0xff] %v1240_v23  ;;  %v989_v34 = vsub.f32 %v477_v27, %v733_v31  ;;  %v479_v36 = vld [vmem:[%s2005_s28 + $0x7d0] sm:$0xff]  ;;  %v480_v41 = vld [vmem:[%s2005_s28 + $0x7d8] sm:$0xff] }
 0x13c   : > { %v1243_v33 = vand.u32 2147483647, %v987_v24  ;;  %v734_v35 = vld [vmem:[%s2013_s24 + $0x7c8] sm:$0xff]  ;;  %v735_v37 = vld [vmem:[%s2013_s24 + $0x7d0] sm:$0xff]  ;;  %1497 = vst [vmem:[%s2034_s20 + $0x7a0] sm:$0xff] %v1241_v28  ;;  %v736_v42 = vld [vmem:[%s2013_s24 + $0x7d8] sm:$0xff] }
 0x13d   : > { %1498 = vst [vmem:[%s2034_s20 + $0x7a8] sm:$0xff] %v1242_v29  ;;  %v1244_v38 = vand.u32 2147483647, %v988_v30  ;;  %v990_v39 = vsub.f32 %v478_v32, %v734_v35  ;;  %v991_v40 = vsub.f32 %v479_v36, %v735_v37  ;;  %v481_v43 = vld [vmem:[%s2005_s28 + $0x7e0] sm:$0xff]  ;;  %v1245_v44 = vand.u32 2147483647, %v989_v34 }
 0x13e   : > { %1499 = vst [vmem:[%s2034_s20 + $0x7b0] sm:$0xff] %v1243_v33  ;;  %v992_v45 = vsub.f32 %v480_v41, %v736_v42  ;;  %v737_v46 = vld [vmem:[%s2013_s24 + $0x7e0] sm:$0xff]  ;;  %v482_v47 = vld [vmem:[%s2005_s28 + $0x7e8] sm:$0xff]  ;;  %v483_v53 = vld [vmem:[%s2005_s28 + $0x7f0] sm:$0xff] }
 0x13f   : > { %v738_v48 = vld [vmem:[%s2013_s24 + $0x7e8] sm:$0xff]  ;;  %1500 = vst [vmem:[%s2034_s20 + $0x7b8] sm:$0xff] %v1244_v38  ;;  %v1246_v49 = vand.u32 2147483647, %v990_v39  ;;  %v1247_v50 = vand.u32 2147483647, %v991_v40  ;;  %v993_v51 = vsub.f32 %v481_v43, %v737_v46 }
 0x140   : > { %v994_v52 = vsub.f32 %v482_v47, %v738_v48  ;;  %v739_v54 = vld [vmem:[%s2013_s24 + $0x7f0] sm:$0xff]  ;;  %1501 = vst [vmem:[%s2034_s20 + $0x7c0] sm:$0xff] %v1245_v44  ;;  %v1248_v55 = vand.u32 2147483647, %v992_v45  ;;  %v484_v57 = vld [vmem:[%s2005_s28 + $0x7f8] sm:$0xff] }
 0x141   : > { %v995_v56 = vsub.f32 %v483_v53, %v739_v54  ;;  %v740_v58 = vld [vmem:[%s2013_s24 + $0x7f8] sm:$0xff]  ;;  %1502 = vst [vmem:[%s2034_s20 + $0x7c8] sm:$0xff] %v1246_v49  ;;  %1503 = vst [vmem:[%s2034_s20 + $0x7d0] sm:$0xff] %v1247_v50  ;;  %v1249_v59 = vand.u32 2147483647, %v993_v51 }
 0x142   : > { %v1250_v60 = vand.u32 2147483647, %v994_v52  ;;  %v996_v61 = vsub.f32 %v484_v57, %v740_v58  ;;  %1504 = vst [vmem:[%s2034_s20 + $0x7d8] sm:$0xff] %v1248_v55  ;;  %1516 = sbr.rel (!%p2860_p6) target bundleno = 354 (0x162), region = 40 }
 0x143   : > { %v1251_v62 = vand.u32 2147483647, %v995_v56  ;;  %1505 = vst [vmem:[%s2034_s20 + $0x7e0] sm:$0xff] %v1249_v59 }
 0x144   : > { %1506 = vst [vmem:[%s2034_s20 + $0x7e8] sm:$0xff] %v1250_v60  ;;  %v1252_v63 = vand.u32 2147483647, %v996_v61 }
 0x145   : > { %1507 = vst [vmem:[%s2034_s20 + $0x7f0] sm:$0xff] %v1251_v62 }
 0x146   : > { %1508 = vst [vmem:[%s2034_s20 + $0x7f8] sm:$0xff] %v1252_v63 }
 0x147   : > { %s2872_s30 = smov (!%p1519_p5, %s1518_s30), 256 }
 0x148   : > { %s2794_s3 = sshll.u32 %s2872_s30, 7 }
 0x149   : > { %s1523_s4 = ssub.s32 32768, %s2794_s3 }
 0x14a   : > { %1524 = vsyncadd %s1510_s7, %s1523_s4  ;;  %p1649_p7 = scmp.ne.s32.totalorder %s2794_s3, 0  ;;  %s1657_s21 = sshll.u32 %s1871_s13, 15 }
 0x14b   : > { %s2804_s14 = scalar_lea.hbm %s2854_s2, %s1657_s21  ;;  %s1529_s16 = sshll.u32 %s2034_s20, 4  ;;  %s2807_s16 = int_to_ptr.vmem [resolvable:$true] %s1529_s16 }
 0x14c   : > { %s1756_s23 = scalar_lea.vmem %s2807_s16, %s2794_s3  ;;  %s1832_s27 = smov [#allocation7]  }
 0x14d   : > { %p1757_p8 = scmp.ne.s32.totalorder %s2807_s16, %s1756_s23  ;;  %s1760_s19 = sshll.u32 %s1832_s27, 4  ;;  %s1761_s19 = int_to_ptr.vmem [resolvable:$false] %s1760_s19 }
 0x14e   : > { %s1762_s13 = scalar_lea.vmem %s1761_s19, 65536  ;;  %p1763_p1 = scmp.lt.s32.totalorder %s2807_s16, %s1761_s19 }
 0x14f   : > { %p1758_p12 = pnand %p1757_p8, %p1649_p7  ;;  %p1764_p3 = scmp.lt.s32.totalorder %s1762_s13, %s1756_s23 }
 0x151   : > { %p1759_p0 = pneg %p1758_p12  ;;  %p1765_p9 = por %p1764_p3, %p1763_p1 }
 0x153   : > { %p1766_p10 = pnand %p1765_p9, %p1759_p0 }
 0x155   : > { %1769 = shalt.err (!%p1766_p10)
}
 0x156   : > { %s1770_s6 = scalar_lea.hbm %s2804_s14, %s2794_s3  ;;  %s1774_s17 = scalar_lea.hbm %s2854_s2, 32896 }
 0x157   : > { %p1771_p11 = scmp.ne.s32.totalorder %s2804_s14, %s1770_s6  ;;  %p1775_p4 = scmp.lt.s32.totalorder %s2804_s14, %s2854_s2 }
 0x158   : > { %p1776_p6 = scmp.lt.s32.totalorder %s1774_s17, %s1770_s6 }
 0x159   : > { %p1772_p13 = pnand %p1771_p11, %p1649_p7 }
 0x15a   : > { %p1777_p5 = por %p1776_p6, %p1775_p4 }
 0x15b   : > { %p1773_p2 = pneg %p1772_p13 }
 0x15d   : > { %p1778_p8 = pnand %p1777_p5, %p1773_p2 }
 0x15f   : > { %1781 = shalt.err (!%p1778_p8)
}
 0x160   : > { %s1833_s25 = smov 128   ;;  %s1834_s30 = smov 8  }
 0x161   : > { %1535 = dma.vmem_to_hbm [thread:$0]  (%p1649_p7), %s2807_s16, %s2794_s3, %s2804_s14, %s1510_s7, %s1833_s25, %s1833_s25, %s1834_s30  }
 0x162 PF: > { %s1544_s4 = sand.u32 1, %s1812_s9   ;;  %p2861_p12 = scmp.ne.s32.totalorder %s2859_s22, 0 }
 0x163   : > { %p2862_p0 = scmp.ge.s32.totalorder %s1824_s12, 2  ;;  %s1545_s21 = scalar_lea.sflag [#allocation4], %s1544_s4 }
 0x165   : > { %p1662_p1 = pnand %p2862_p0, %p2861_p12 }
 0x167   : > { %p1663_p3 = pneg %p1662_p1 }
 0x169   : > { %1807 = dma.done.wait (%p1663_p3), %s1545_s21, 32768  }
 0x16a   : > { %1809 = vsyncadd (%p1663_p3), %s1545_s21, 4294934528  ;;  %p18_p9 = scmp.ge.s32.totalorder %s1875_s15, 4   ;;  %s2863_s9 = smov %s1816_s10 }
 0x16b   : > { %s2864_s10 = smov %s1820_s11  ;;  %s2865_s11 = smov %s1887_s18 }
 0x16c   : > { %s2866_s12 = smov %s1875_s15  ;;  %20 = sbr.rel (!%p18_p9) target bundleno = 7 (0x7), region = 86 }
 0x171   :  { %1550 = vsyncpa [#allocation3], 1 }
 0x172   :  { %1552 = vsyncpa [#allocation3 + $0x1], 1 }
 0x173   :  { %1553 = vsyncpa [#allocation6], 1 }
 0x174   :  { %1555 = vsyncpa [#allocation6 + $0x1], 1 }
 0x175   :  { %1556 = vsyncpa [#allocation4], 1 }
 0x176   :  { %1558 = vsyncpa [#allocation4 + $0x1], 1 }

</bundles_post_ra>
